<compile_context>
chip_gen: v7x
topology: tpu7x:2x2x1
jax: 0.10.0
libtpu: 0.0.40
codegen_flags: <defaults>
</compile_context>

<pallas_src>
import functools
import math

import jax
import jax.numpy as jnp
import numpy as np
from jax.experimental import pallas as pl
from jax.experimental.pallas import tpu as pltpu

IN_CHANNELS = 32
OUT_CHANNELS = 8
HEADS = 4
HC = HEADS * OUT_CHANNELS          # == IN_CHANNELS so the residual add is valid (concat=True)
QKV_PAD = 128                      # 3*HC = 96 zero-padded to a lane-dense 128-column slab
LN_EPS = 1e-5                      # nn.LayerNorm default
SCALE = 1.0 / math.sqrt(OUT_CHANNELS)


def _round_up(a, b):
    return -(-a // b) * b


def _layer_norm(z, g, b):
    mu = jnp.mean(z, axis=-1, keepdims=True)
    var = jnp.mean((z - mu) * (z - mu), axis=-1, keepdims=True)
    return (z - mu) * jax.lax.rsqrt(var + LN_EPS) * g + b


def _vmem_estimate(tile_e, e_pad, N, F):
    """Rough VMEM bytes: double-buffered streamed blocks + residents + stash."""
    stream = 2 * tile_e * (2 * N * 2 + F * 4 + HC * 4)          # S,D bf16 + ef,y f32
    stash = e_pad * (HC * 4 + HC * 2)                            # s (f32) + v (bf16)
    resident = (N * F * 4 + N * QKV_PAD * 2 + N * HC * 2         # nf, qkv_sc, key_sc
                + 3 * N * HC * 4 + N * HC * 2                    # denom/h/x f32, recip bf16
                + F * (QKV_PAD + HC) * 4 + 8 * HC * 4 + QKV_PAD * 4)
    return stream + stash + resident


def _kernel(nf_ref, ef_ref, S_ref, D_ref, sumblk_ref,
            wqkv_ref, bqkv_ref, we_ref, be_ref, ln_ref,
            x_ref, y_ref,
            qkv_sc, key_sc, denom_sc, recip_sc, h_sc, cmax_sc,
            s_stash, v_stash, *, tile_e):
    f32 = jnp.float32
    bf16 = jnp.bfloat16
    p = pl.program_id(0)            # 0: scores + softmax denominators, 1: apply attention
    eb = pl.program_id(1)           # edge-block index
    n_eb = pl.num_programs(1)
    off = pl.multiple_of(eb * tile_e, tile_e)

    D_blk = D_ref[...]              # [tE, N] bf16 one-hot(dst) -- needed in both phases

    # ---- one-time init: fused q|k|v node projection into a lane-dense slab ----
    @pl.when(jnp.logical_and(p == 0, eb == 0))
    def _init():
        qkv = jnp.dot(nf_ref[...], wqkv_ref[...], preferred_element_type=f32) + bqkv_ref[...]
        qkv_b = qkv.astype(bf16)                 # [N, 128] cols: q | k | v | 0-pad
        qkv_sc[...] = qkv_b
        key_sc[...] = qkv_b[:, HC:2 * HC]        # one-time key slice (not per grid step)
        denom_sc[...] = jnp.zeros_like(denom_sc)
        h_sc[...] = jnp.zeros_like(h_sc)
        cmax_sc[...] = jnp.full_like(cmax_sc, -1e30)

    # ---- phase 0: per-edge scores, edge output y, stash, denominator segsum ----
    @pl.when(p == 0)
    def _phase0():
        ef_blk = ef_ref[...]                     # [tE, F]  (streamed only in this phase)
        S_blk = S_ref[...]                       # [tE, N]  bf16 one-hot(src)

        srcg = jnp.dot(S_blk, qkv_sc[...], preferred_element_type=f32)    # [tE, 128]
        kdst = jnp.dot(D_blk, key_sc[...], preferred_element_type=f32)    # [tE, HC]
        q_e = srcg[:, :HC]
        v_e = srcg[:, 2 * HC:3 * HC]
        e_proj = jnp.dot(ef_blk, we_ref[...], preferred_element_type=f32) + be_ref[...]
        m = q_e * kdst + e_proj                  # [tE, HC]
        s = m * SCALE

        # edge output: written exactly once (phase 0 only)
        ln = ln_ref[...]
        y_ref[...] = _layer_norm(m, ln[2:3, :], ln[3:4, :]) + ef_blk

        # stash per-edge scaled scores + src values so phase 1 needs only D
        s_stash[pl.ds(off, tile_e), :] = s
        v_stash[pl.ds(off, tile_e), :] = v_e.astype(bf16)

        # online per-column max (uniform shift -> softmax unchanged) + denominators.
        # Rescale is left unconditional: a [N,HC] VPU mul + [1,HC] EUP exp per step,
        # cheaper than a data-dependent branch at this size.
        old_max = cmax_sc[...]                   # [1, HC]
        new_max = jnp.maximum(old_max, jnp.max(s, axis=0, keepdims=True))
        exp_s = jnp.exp(s - new_max)
        denom_sc[...] = denom_sc[...] * jnp.exp(old_max - new_max) + jax.lax.dot_general(
            D_blk, exp_s.astype(bf16),
            dimension_numbers=(((0,), (0,)), ((), ())),   # contract over the edge axis
            preferred_element_type=f32)                   # -> [N, HC]
        cmax_sc[...] = new_max

    # ---- phase 1: normalize, per-head alpha, message aggregation, node out ----
    @pl.when(p == 1)
    def _phase1():
        @pl.when(eb == 0)
        def _finalize_denom():
            d = denom_sc[...]
            safe = jnp.where(d > 0, d, 1.0)
            # exact reciprocal, computed once per node; zero in-degree nodes -> 0
            recip_sc[...] = jnp.where(d > 0, 1.0 / safe, 0.0).astype(bf16)

        s_blk = s_stash[pl.ds(off, tile_e), :]                                 # [tE, HC]
        exp_s = jnp.exp(s_blk - cmax_sc[...])
        recip_e = jnp.dot(D_blk, recip_sc[...], preferred_element_type=f32)    # gather 1/denom
        softmax_e = exp_s * recip_e
        # per-head channel sum, broadcast back per head (bf16 block-diag, exact 0/1)
        alpha = jnp.dot(softmax_e.astype(jnp.bfloat16), sumblk_ref[...],
                        preferred_element_type=f32)                            # [tE, HC]
        # (dropout on alpha omitted; see TODO at top)
        weighted = v_stash[pl.ds(off, tile_e), :].astype(f32) * alpha
        h_sc[...] = h_sc[...] + jax.lax.dot_general(
            D_blk, weighted.astype(bf16),
            dimension_numbers=(((0,), (0,)), ((), ())),
            preferred_element_type=f32)                                        # [N, HC]

        @pl.when(eb == n_eb - 1)
        def _finalize_x():
            ln = ln_ref[...]
            x_ref[...] = _layer_norm(h_sc[...], ln[0:1, :], ln[1:2, :]) + nf_ref[...]


def multiheaded_forward(node_feats, edge_feats, src, dst, params, *,
                        tile_e=None, vmem_limit_bytes=None):
    N, F = node_feats.shape
    E = edge_feats.shape[0]

    # ---- edge tile: large (amortize per-step grid overhead), multiple of 16,
    #      bounded by a VMEM budget that is safe across v5e/v6e/v7x. ----
    if tile_e is None:
        budget = 24 << 20
        tile_e = 512
        while tile_e > 16 and _vmem_estimate(
                tile_e, _round_up(max(E, 1), tile_e), N, F) > budget:
            tile_e //= 2
    tile_e = int(max(16, min(_round_up(tile_e, 16), _round_up(max(E, 1), 16))))
    n_eb = max(1, _round_up(max(E, 1), tile_e) // tile_e)
    e_pad = n_eb * tile_e

    if vmem_limit_bytes is None:
        est = _vmem_estimate(tile_e, e_pad, N, F)
        vmem_limit_bytes = int(min(48 << 20, max(32 << 20, 2 * est)))

    # one-hot connectivity in bf16 (0/1 exact); zero-padded rows contribute nothing
    S = jax.nn.one_hot(src, N, dtype=jnp.bfloat16)     # [E, N]
    D = jax.nn.one_hot(dst, N, dtype=jnp.bfloat16)
    ef = edge_feats
    if e_pad != E:
        pad = ((0, e_pad - E), (0, 0))
        S, D, ef = jnp.pad(S, pad), jnp.pad(D, pad), jnp.pad(ef, pad)

    head_id = jnp.arange(HC) // OUT_CHANNELS
    sumblk = (head_id[:, None] == head_id[None, :]).astype(jnp.bfloat16)  # [HC, HC] block-diag

    # fused / packed / lane-padded parameters
    wqkv = jnp.concatenate([params['wq'], params['wk'], params['wv']], axis=1)   # [F, 3*HC]
    bqkv = jnp.concatenate([params['bq'], params['bk'], params['bv']], axis=1)   # [1, 3*HC]
    wqkv = jnp.pad(wqkv, ((0, 0), (0, QKV_PAD - 3 * HC)))                        # [F, 128]
    bqkv = jnp.pad(bqkv, ((0, 0), (0, QKV_PAD - 3 * HC)))                        # [1, 128]
    ln = jnp.concatenate([params['gn'], params['bn'], params['ge'], params['be2']], axis=0)  # [4, HC]

    last = n_eb - 1
    full = lambda shape: pl.BlockSpec(shape, lambda p, e: (0, 0))
    eblk = lambda shape: pl.BlockSpec(shape, lambda p, e: (e, 0))
    # streamed in phase 0 only; phase-1 visits park on the last block (no refetch)
    eblk_p0 = lambda shape: pl.BlockSpec(shape, lambda p, e: (e * (1 - p) + p * last, 0))

    grid_spec = pltpu.PrefetchScalarGridSpec(
        num_scalar_prefetch=0,
        grid=(2, n_eb),                          # (phase, edge-block)
        in_specs=[
            full((N, F)),                        # node feats (resident)
            eblk_p0((tile_e, F)),                # edge feats          (phase 0 only)
            eblk_p0((tile_e, N)),                # one-hot src         (phase 0 only)
            eblk((tile_e, N)),                   # one-hot dst         (both phases)
            full((HC, HC)),                      # per-head channel-sum matrix (bf16)
            full((F, QKV_PAD)),                  # fused q|k|v weight, 128-lane padded
            full((1, QKV_PAD)),                  # fused q|k|v bias, 128-lane padded
            full((F, HC)),                       # edge-proj weight
            full((1, HC)),                       # edge-proj bias
            full((4, HC)),                       # packed LayerNorm params
        ],
        out_specs=[
            pl.BlockSpec((N, HC), lambda p, e: (0, 0)),                    # x (resident)
            # real blocks written in phase 0; phase-1 visits park on a trash block
            pl.BlockSpec((tile_e, HC), lambda p, e: (e * (1 - p) + p * n_eb, 0)),
        ],
        scratch_shapes=[
            pltpu.VMEM((N, QKV_PAD), jnp.bfloat16),   # fused node projections (lane-dense)
            pltpu.VMEM((N, HC), jnp.bfloat16),        # key columns (one-time slice)
            pltpu.VMEM((N, HC), jnp.float32),         # softmax denominators
            pltpu.VMEM((N, HC), jnp.bfloat16),        # denominator reciprocals (written once)
            pltpu.VMEM((N, HC), jnp.float32),         # aggregated node messages
            pltpu.VMEM((1, HC), jnp.float32),         # running per-column score max
            pltpu.VMEM((e_pad, HC), jnp.float32),     # per-edge scaled-score stash
            pltpu.VMEM((e_pad, HC), jnp.bfloat16),    # per-edge src-value stash
        ],
    )

    x, y = pl.pallas_call(
        functools.partial(_kernel, tile_e=tile_e),
        out_shape=(jax.ShapeDtypeStruct((N, HC), jnp.float32),
                   jax.ShapeDtypeStruct(((n_eb + 1) * tile_e, HC), jnp.float32)),
        grid_spec=grid_spec,
        compiler_params=pltpu.CompilerParams(
            # both axes carry reductions / resident accumulators -> 'arbitrary'
            dimension_semantics=("arbitrary", "arbitrary"),
            vmem_limit_bytes=vmem_limit_bytes),
    )(node_feats, ef, S, D, sumblk, wqkv, bqkv, params['we'], params['be'], ln)
    return x, y[:E]


def reference(node_feats, edge_feats, src, dst, params):
    """Pure-JAX reference (mirrors the PyTorch/DGL forward, eval-mode dropout)."""
    N = node_feats.shape[0]
    E = edge_feats.shape[0]
    q = node_feats @ params['wq'] + params['bq']
    k = node_feats @ params['wk'] + params['bk']
    v = node_feats @ params['wv'] + params['bv']
    e = edge_feats @ params['we'] + params['be']

    m = q[src] * k[dst] + e
    s = m / math.sqrt(OUT_CHANNELS)
    max_n = jax.ops.segment_max(s, dst, num_segments=N)
    max_n = jnp.where(jnp.isfinite(max_n), max_n, 0.0)
    exp_s = jnp.exp(s - max_n[dst])
    denom = jax.ops.segment_sum(exp_s, dst, num_segments=N)
    sm = exp_s / denom[dst]
    alpha = sm.reshape(E, HEADS, OUT_CHANNELS).sum(-1)                       # [E, H]
    weighted = (v[src].reshape(E, HEADS, OUT_CHANNELS) * alpha[:, :, None]).reshape(E, HC)
    h = jax.ops.segment_sum(weighted, dst, num_segments=N)

    def ln(z, g, b):
        mu = z.mean(-1, keepdims=True)
        var = ((z - mu) ** 2).mean(-1, keepdims=True)
        return (z - mu) / jnp.sqrt(var + LN_EPS) * g + b

    x = ln(h, params['gn'], params['bn']) + node_feats
    y = ln(m, params['ge'], params['be2']) + edge_feats
    return x, y


if __name__ == "__main__":
    key = jax.random.PRNGKey(0)
    keys = jax.random.split(key, 12)

    N, E = 8, 48
    node_feats = jax.random.normal(keys[0], (N, IN_CHANNELS), jnp.float32)
    edge_feats = jax.random.normal(keys[1], (E, IN_CHANNELS), jnp.float32)
    src = jax.random.randint(keys[2], (E,), 0, N)
    dst = jax.random.randint(keys[3], (E,), 0, N)

    # Deterministic parameter init (PyTorch Linear-style uniform bounds).
    bound = 1.0 / math.sqrt(IN_CHANNELS)

    def lin(kw, kb):
        w = jax.random.uniform(kw, (IN_CHANNELS, HC), jnp.float32, -bound, bound)
        b = jax.random.uniform(kb, (1, HC), jnp.float32, -bound, bound)
        return w, b

    wq, bq = lin(keys[4], keys[5])
    wk, bk = lin(keys[6], keys[7])
    wv, bv = lin(keys[8], keys[9])
    we, be = lin(keys[10], keys[11])
    params = dict(
        wq=wq, bq=bq, wk=wk, bk=bk, wv=wv, bv=bv, we=we, be=be,
        gn=jnp.ones((1, HC), jnp.float32), bn=jnp.zeros((1, HC), jnp.float32),
        ge=jnp.ones((1, HC), jnp.float32), be2=jnp.zeros((1, HC), jnp.float32),
    )

    x_ref, y_ref = reference(node_feats, edge_feats, src, dst, params)

    ok = True
    # auto-derived tile (single edge block) and an explicit small tile (multi-block path)
    for te in (None, 16):
        x, y = multiheaded_forward(node_feats, edge_feats, src, dst, params, tile_e=te)
        jax.block_until_ready((x, y))
        ok = ok and np.allclose(np.asarray(x), np.asarray(x_ref), rtol=3e-2, atol=3e-2)
        ok = ok and np.allclose(np.asarray(y), np.asarray(y_ref), rtol=3e-2, atol=3e-2)

    if not ok:
        raise AssertionError("Pallas kernel output mismatch vs JAX reference")
    print("KERNEL_OK")
</pallas_src>

<mosaic_0001>
module attributes {stable_mosaic.version = 11 : i64} {
  func.func @_kernel(%arg0: i32, %arg1: i32, %arg2: memref<8x32xf32, #tpu.memory_space<vmem>>, %arg3: memref<48x32xf32, #tpu.memory_space<vmem>>, %arg4: memref<48x8xbf16, #tpu.memory_space<vmem>>, %arg5: memref<48x8xbf16, #tpu.memory_space<vmem>>, %arg6: memref<32x32xbf16, #tpu.memory_space<vmem>>, %arg7: memref<32x128xf32, #tpu.memory_space<vmem>>, %arg8: memref<1x128xf32, #tpu.memory_space<vmem>>, %arg9: memref<32x32xf32, #tpu.memory_space<vmem>>, %arg10: memref<1x32xf32, #tpu.memory_space<vmem>>, %arg11: memref<4x32xf32, #tpu.memory_space<vmem>>, %arg12: memref<8x32xf32, #tpu.memory_space<vmem>>, %arg13: memref<48x32xf32, #tpu.memory_space<vmem>>, %arg14: memref<8x128xbf16, #tpu.memory_space<vmem>>, %arg15: memref<8x32xbf16, #tpu.memory_space<vmem>>, %arg16: memref<8x32xf32, #tpu.memory_space<vmem>>, %arg17: memref<8x32xbf16, #tpu.memory_space<vmem>>, %arg18: memref<8x32xf32, #tpu.memory_space<vmem>>, %arg19: memref<1x32xf32, #tpu.memory_space<vmem>>, %arg20: memref<48x32xf32, #tpu.memory_space<vmem>>, %arg21: memref<48x32xbf16, #tpu.memory_space<vmem>>) attributes {dimension_semantics = [#tpu.dimension_semantics<arbitrary>, #tpu.dimension_semantics<arbitrary>], iteration_bounds = array<i64: 2, 1>, scalar_prefetch = 0 : i64, scratch_operands = 8 : i64, tpu.core_type = #tpu.core_type<tc>, window_params = [{pipeline_mode = #tpu.pipeline_mode<synchronous>, transform_indices = @transform_0, window_bounds = array<i64: 8, 32>}, {transform_indices = @transform_1, window_bounds = array<i64: 48, 32>}, {transform_indices = @transform_2, window_bounds = array<i64: 48, 8>}, {transform_indices = @transform_3, window_bounds = array<i64: 48, 8>}, {pipeline_mode = #tpu.pipeline_mode<synchronous>, transform_indices = @transform_4, window_bounds = array<i64: 32, 32>}, {pipeline_mode = #tpu.pipeline_mode<synchronous>, transform_indices = @transform_5, window_bounds = array<i64: 32, 128>}, {pipeline_mode = #tpu.pipeline_mode<synchronous>, transform_indices = @transform_6, window_bounds = array<i64: 1, 128>}, {pipeline_mode = #tpu.pipeline_mode<synchronous>, transform_indices = @transform_7, window_bounds = array<i64: 32, 32>}, {pipeline_mode = #tpu.pipeline_mode<synchronous>, transform_indices = @transform_8, window_bounds = array<i64: 1, 32>}, {pipeline_mode = #tpu.pipeline_mode<synchronous>, transform_indices = @transform_9, window_bounds = array<i64: 4, 32>}, {pipeline_mode = #tpu.pipeline_mode<synchronous>, transform_indices = @transform_10, window_bounds = array<i64: 8, 32>}, {transform_indices = @transform_11, window_bounds = array<i64: 48, 32>}]} {
    %c48_i32 = arith.constant 48 : i32
    %0 = arith.muli %arg1, %c48_i32 : i32
    %1 = tpu.assume_multiple %0, 48 : i32
    %c0 = arith.constant 0 : index
    %c0_0 = arith.constant 0 : index
    %2 = vector.load %arg5[%c0, %c0_0] : memref<48x8xbf16, #tpu.memory_space<vmem>>, vector<48x8xbf16>
    %c0_i32 = arith.constant 0 : i32
    %3 = arith.cmpi eq, %arg0, %c0_i32 : i32
    %c0_i32_1 = arith.constant 0 : i32
    %4 = arith.cmpi eq, %arg1, %c0_i32_1 : i32
    %5 = arith.andi %3, %4 : i1
    %6 = arith.extui %5 : i1 to i32
    %c0_i32_2 = arith.constant 0 : i32
    %7 = arith.cmpi ne, %6, %c0_i32_2 : i32
    scf.if %7 {
      %c0_6 = arith.constant 0 : index
      %c0_7 = arith.constant 0 : index
      %14 = vector.load %arg2[%c0_6, %c0_7] : memref<8x32xf32, #tpu.memory_space<vmem>>, vector<8x32xf32>
      %c0_8 = arith.constant 0 : index
      %c0_9 = arith.constant 0 : index
      %15 = vector.load %arg7[%c0_8, %c0_9] : memref<32x128xf32, #tpu.memory_space<vmem>>, vector<32x128xf32>
      %cst = arith.constant dense<0.000000e+00> : vector<8x128xf32>
      %16 = tpu.matmul %14, %15, %cst {dimension_numbers = #tpu.dot_dimension_numbers<[1], [0], [0], [1], [0, 0, 1, 1], [], []>} : vector<8x32xf32>, vector<32x128xf32>, vector<8x128xf32> -> vector<8x128xf32>
      %c0_10 = arith.constant 0 : index
      %c0_11 = arith.constant 0 : index
      %17 = vector.load %arg8[%c0_10, %c0_11] : memref<1x128xf32, #tpu.memory_space<vmem>>, vector<1x128xf32>
      %18 = vector.broadcast %17 : vector<1x128xf32> to vector<8x128xf32>
      %19 = arith.addf %16, %18 : vector<8x128xf32>
      %20 = arith.truncf %19 : vector<8x128xf32> to vector<8x128xbf16>
      %c0_12 = arith.constant 0 : index
      %c0_13 = arith.constant 0 : index
      %21 = vector.load %arg14[%c0_12, %c0_13] : memref<8x128xbf16, #tpu.memory_space<vmem>>, vector<8x128xbf16>
      tpu.vector_store %arg14[%c0_12, %c0_13], %20 {strides = array<i32>} : memref<8x128xbf16, #tpu.memory_space<vmem>>, vector<8x128xbf16>,
      %22 = vector.extract_strided_slice %20 {offsets = [0, 32], sizes = [8, 32], strides = [1, 1]} : vector<8x128xbf16> to vector<8x32xbf16>
      %c0_14 = arith.constant 0 : index
      %c0_15 = arith.constant 0 : index
      %23 = vector.load %arg15[%c0_14, %c0_15] : memref<8x32xbf16, #tpu.memory_space<vmem>>, vector<8x32xbf16>
      tpu.vector_store %arg15[%c0_14, %c0_15], %22 {strides = array<i32>} : memref<8x32xbf16, #tpu.memory_space<vmem>>, vector<8x32xbf16>,
      %cst_16 = arith.constant 0.000000e+00 : f32
      %24 = vector.broadcast %cst_16 : f32 to vector<8x32xf32>
      %c0_17 = arith.constant 0 : index
      %c0_18 = arith.constant 0 : index
      %25 = vector.load %arg16[%c0_17, %c0_18] : memref<8x32xf32, #tpu.memory_space<vmem>>, vector<8x32xf32>
      tpu.vector_store %arg16[%c0_17, %c0_18], %24 {strides = array<i32>} : memref<8x32xf32, #tpu.memory_space<vmem>>, vector<8x32xf32>,
      %cst_19 = arith.constant 0.000000e+00 : f32
      %26 = vector.broadcast %cst_19 : f32 to vector<8x32xf32>
      %c0_20 = arith.constant 0 : index
      %c0_21 = arith.constant 0 : index
      %27 = vector.load %arg18[%c0_20, %c0_21] : memref<8x32xf32, #tpu.memory_space<vmem>>, vector<8x32xf32>
      tpu.vector_store %arg18[%c0_20, %c0_21], %26 {strides = array<i32>} : memref<8x32xf32, #tpu.memory_space<vmem>>, vector<8x32xf32>,
      %cst_22 = arith.constant -1.000000e+30 : f32
      %28 = vector.broadcast %cst_22 : f32 to vector<1x32xf32>
      %c0_23 = arith.constant 0 : index
      %c0_24 = arith.constant 0 : index
      %29 = vector.load %arg19[%c0_23, %c0_24] : memref<1x32xf32, #tpu.memory_space<vmem>>, vector<1x32xf32>
      tpu.vector_store %arg19[%c0_23, %c0_24], %28 {strides = array<i32>} : memref<1x32xf32, #tpu.memory_space<vmem>>, vector<1x32xf32>,
    } else {
    }
    %c0_i32_3 = arith.constant 0 : i32
    %8 = arith.cmpi eq, %arg0, %c0_i32_3 : i32
    %9 = arith.extui %8 : i1 to i32
    %c0_i32_4 = arith.constant 0 : i32
    %10 = arith.cmpi ne, %9, %c0_i32_4 : i32
    scf.if %10 {
      %c0_6 = arith.constant 0 : index
      %c0_7 = arith.constant 0 : index
      %14 = vector.load %arg3[%c0_6, %c0_7] : memref<48x32xf32, #tpu.memory_space<vmem>>, vector<48x32xf32>
      %c0_8 = arith.constant 0 : index
      %c0_9 = arith.constant 0 : index
      %15 = vector.load %arg4[%c0_8, %c0_9] : memref<48x8xbf16, #tpu.memory_space<vmem>>, vector<48x8xbf16>
      %c0_10 = arith.constant 0 : index
      %c0_11 = arith.constant 0 : index
      %16 = vector.load %arg14[%c0_10, %c0_11] : memref<8x128xbf16, #tpu.memory_space<vmem>>, vector<8x128xbf16>
      %cst = arith.constant dense<0.000000e+00> : vector<48x128xf32>
      %17 = tpu.matmul %15, %16, %cst {dimension_numbers = #tpu.dot_dimension_numbers<[1], [0], [0], [1], [0, 0, 1, 1], [], []>} : vector<48x8xbf16>, vector<8x128xbf16>, vector<48x128xf32> -> vector<48x128xf32>
      %c0_12 = arith.constant 0 : index
      %c0_13 = arith.constant 0 : index
      %18 = vector.load %arg15[%c0_12, %c0_13] : memref<8x32xbf16, #tpu.memory_space<vmem>>, vector<8x32xbf16>
      %cst_14 = arith.constant dense<0.000000e+00> : vector<48x32xf32>
      %19 = tpu.matmul %2, %18, %cst_14 {dimension_numbers = #tpu.dot_dimension_numbers<[1], [0], [0], [1], [0, 0, 1, 1], [], []>} : vector<48x8xbf16>, vector<8x32xbf16>, vector<48x32xf32> -> vector<48x32xf32>
      %20 = vector.extract_strided_slice %17 {offsets = [0, 0], sizes = [48, 32], strides = [1, 1]} : vector<48x128xf32> to vector<48x32xf32>
      %21 = vector.extract_strided_slice %17 {offsets = [0, 64], sizes = [48, 32], strides = [1, 1]} : vector<48x128xf32> to vector<48x32xf32>
      %c0_15 = arith.constant 0 : index
      %c0_16 = arith.constant 0 : index
      %22 = vector.load %arg9[%c0_15, %c0_16] : memref<32x32xf32, #tpu.memory_space<vmem>>, vector<32x32xf32>
      %cst_17 = arith.constant dense<0.000000e+00> : vector<48x32xf32>
      %23 = tpu.matmul %14, %22, %cst_17 {dimension_numbers = #tpu.dot_dimension_numbers<[1], [0], [0], [1], [0, 0, 1, 1], [], []>} : vector<48x32xf32>, vector<32x32xf32>, vector<48x32xf32> -> vector<48x32xf32>
      %c0_18 = arith.constant 0 : index
      %c0_19 = arith.constant 0 : index
      %24 = vector.load %arg10[%c0_18, %c0_19] : memref<1x32xf32, #tpu.memory_space<vmem>>, vector<1x32xf32>
      %25 = vector.broadcast %24 : vector<1x32xf32> to vector<48x32xf32>
      %26 = arith.addf %23, %25 : vector<48x32xf32>
      %27 = arith.mulf %20, %19 : vector<48x32xf32>
      %28 = arith.addf %27, %26 : vector<48x32xf32>
      %cst_20 = arith.constant 0.353553385 : f32
      %29 = vector.broadcast %cst_20 : f32 to vector<48x32xf32>
      %30 = arith.mulf %28, %29 : vector<48x32xf32>
      %c0_21 = arith.constant 0 : index
      %c0_22 = arith.constant 0 : index
      %31 = vector.load %arg11[%c0_21, %c0_22] : memref<4x32xf32, #tpu.memory_space<vmem>>, vector<4x32xf32>
      %32 = vector.extract_strided_slice %31 {offsets = [2, 0], sizes = [1, 32], strides = [1, 1]} : vector<4x32xf32> to vector<1x32xf32>
      %33 = vector.extract_strided_slice %31 {offsets = [3, 0], sizes = [1, 32], strides = [1, 1]} : vector<4x32xf32> to vector<1x32xf32>
      %cst_23 = arith.constant dense<0.000000e+00> : vector<48xf32>
      %34 = vector.multi_reduction <add>, %28, %cst_23 [1] : vector<48x32xf32> to vector<48xf32>
      %35 = vector.shape_cast %34 : vector<48xf32> to vector<48x1xf32>
      %cst_24 = arith.constant 3.200000e+01 : f32
      %36 = vector.broadcast %cst_24 : f32 to vector<48x1xf32>
      %37 = arith.divf %35, %36 : vector<48x1xf32>
      %38 = vector.broadcast %37 : vector<48x1xf32> to vector<48x32xf32>
      %39 = arith.subf %28, %38 : vector<48x32xf32>
      %40 = vector.broadcast %37 : vector<48x1xf32> to vector<48x32xf32>
      %41 = arith.subf %28, %40 : vector<48x32xf32>
      %42 = arith.mulf %39, %41 : vector<48x32xf32>
      %cst_25 = arith.constant dense<0.000000e+00> : vector<48xf32>
      %43 = vector.multi_reduction <add>, %42, %cst_25 [1] : vector<48x32xf32> to vector<48xf32>
      %44 = vector.shape_cast %43 : vector<48xf32> to vector<48x1xf32>
      %cst_26 = arith.constant 3.200000e+01 : f32
      %45 = vector.broadcast %cst_26 : f32 to vector<48x1xf32>
      %46 = arith.divf %44, %45 : vector<48x1xf32>
      %47 = vector.broadcast %37 : vector<48x1xf32> to vector<48x32xf32>
      %48 = arith.subf %28, %47 : vector<48x32xf32>
      %cst_27 = arith.constant 9.99999974E-6 : f32
      %49 = vector.broadcast %cst_27 : f32 to vector<48x1xf32>
      %50 = arith.addf %46, %49 : vector<48x1xf32>
      %51 = math.rsqrt %50 : vector<48x1xf32>
      %52 = vector.broadcast %51 : vector<48x1xf32> to vector<48x32xf32>
      %53 = arith.mulf %48, %52 : vector<48x32xf32>
      %54 = vector.broadcast %32 : vector<1x32xf32> to vector<48x32xf32>
      %55 = arith.mulf %53, %54 : vector<48x32xf32>
      %56 = vector.broadcast %33 : vector<1x32xf32> to vector<48x32xf32>
      %57 = arith.addf %55, %56 : vector<48x32xf32>
      %58 = arith.addf %57, %14 : vector<48x32xf32>
      %c0_28 = arith.constant 0 : index
      %c0_29 = arith.constant 0 : index
      %59 = vector.load %arg13[%c0_28, %c0_29] : memref<48x32xf32, #tpu.memory_space<vmem>>, vector<48x32xf32>
      tpu.vector_store %arg13[%c0_28, %c0_29], %58 {strides = array<i32>} : memref<48x32xf32, #tpu.memory_space<vmem>>, vector<48x32xf32>,
      %60 = arith.index_cast %1 : i32 to index
      %c0_30 = arith.constant 0 : index
      %61 = vector.load %arg20[%60, %c0_30] : memref<48x32xf32, #tpu.memory_space<vmem>>, vector<48x32xf32>
      tpu.vector_store %arg20[%60, %c0_30], %30 {strides = array<i32>} : memref<48x32xf32, #tpu.memory_space<vmem>>, vector<48x32xf32>,
      %62 = arith.truncf %21 : vector<48x32xf32> to vector<48x32xbf16>
      %63 = arith.index_cast %1 : i32 to index
      %c0_31 = arith.constant 0 : index
      %64 = vector.load %arg21[%63, %c0_31] : memref<48x32xbf16, #tpu.memory_space<vmem>>, vector<48x32xbf16>
      tpu.vector_store %arg21[%63, %c0_31], %62 {strides = array<i32>} : memref<48x32xbf16, #tpu.memory_space<vmem>>, vector<48x32xbf16>,
      %c0_32 = arith.constant 0 : index
      %c0_33 = arith.constant 0 : index
      %65 = vector.load %arg19[%c0_32, %c0_33] : memref<1x32xf32, #tpu.memory_space<vmem>>, vector<1x32xf32>
      %cst_34 = arith.constant dense<0xFF800000> : vector<32xf32>
      %66 = vector.multi_reduction <maximumf>, %30, %cst_34 [0] : vector<48x32xf32> to vector<32xf32>
      %67 = vector.shape_cast %66 : vector<32xf32> to vector<1x32xf32>
      %68 = arith.maximumf %65, %67 : vector<1x32xf32>
      %69 = vector.broadcast %68 : vector<1x32xf32> to vector<48x32xf32>
      %70 = arith.subf %30, %69 : vector<48x32xf32>
      %71 = math.exp %70 : vector<48x32xf32>
      %c0_35 = arith.constant 0 : index
      %c0_36 = arith.constant 0 : index
      %72 = vector.load %arg16[%c0_35, %c0_36] : memref<8x32xf32, #tpu.memory_space<vmem>>, vector<8x32xf32>
      %73 = arith.subf %65, %68 : vector<1x32xf32>
      %74 = math.exp %73 : vector<1x32xf32>
      %75 = vector.broadcast %74 : vector<1x32xf32> to vector<8x32xf32>
      %76 = arith.mulf %72, %75 : vector<8x32xf32>
      %77 = arith.truncf %71 : vector<48x32xf32> to vector<48x32xbf16>
      %cst_37 = arith.constant dense<0.000000e+00> : vector<8x32xf32>
      %78 = tpu.matmul %2, %77, %cst_37 {dimension_numbers = #tpu.dot_dimension_numbers<[0], [0], [1], [1], [0, 1, 1, 1], [], []>} : vector<48x8xbf16>, vector<48x32xbf16>, vector<8x32xf32> -> vector<8x32xf32>
      %79 = arith.addf %76, %78 : vector<8x32xf32>
      %c0_38 = arith.constant 0 : index
      %c0_39 = arith.constant 0 : index
      %80 = vector.load %arg16[%c0_38, %c0_39] : memref<8x32xf32, #tpu.memory_space<vmem>>, vector<8x32xf32>
      tpu.vector_store %arg16[%c0_38, %c0_39], %79 {strides = array<i32>} : memref<8x32xf32, #tpu.memory_space<vmem>>, vector<8x32xf32>,
      %c0_40 = arith.constant 0 : index
      %c0_41 = arith.constant 0 : index
      %81 = vector.load %arg19[%c0_40, %c0_41] : memref<1x32xf32, #tpu.memory_space<vmem>>, vector<1x32xf32>
      tpu.vector_store %arg19[%c0_40, %c0_41], %68 {strides = array<i32>} : memref<1x32xf32, #tpu.memory_space<vmem>>, vector<1x32xf32>,
    } else {
    }
    %c1_i32 = arith.constant 1 : i32
    %11 = arith.cmpi eq, %arg0, %c1_i32 : i32
    %12 = arith.extui %11 : i1 to i32
    %c0_i32_5 = arith.constant 0 : i32
    %13 = arith.cmpi ne, %12, %c0_i32_5 : i32
    scf.if %13 {
      %c0_i32_6 = arith.constant 0 : i32
      %14 = arith.cmpi eq, %arg1, %c0_i32_6 : i32
      %15 = arith.extui %14 : i1 to i32
      %c0_i32_7 = arith.constant 0 : i32
      %16 = arith.cmpi ne, %15, %c0_i32_7 : i32
      scf.if %16 {
        %c0_24 = arith.constant 0 : index
        %c0_25 = arith.constant 0 : index
        %41 = vector.load %arg16[%c0_24, %c0_25] : memref<8x32xf32, #tpu.memory_space<vmem>>, vector<8x32xf32>
        %cst_26 = arith.constant 0.000000e+00 : f32
        %42 = vector.broadcast %cst_26 : f32 to vector<8x32xf32>
        %43 = arith.cmpf ogt, %41, %42 : vector<8x32xf32>
        %cst_27 = arith.constant 1.000000e+00 : f32
        %44 = vector.broadcast %cst_27 : f32 to vector<8x32xf32>
        %45 = arith.select %43, %41, %44 : vector<8x32xi1>, vector<8x32xf32>
        %cst_28 = arith.constant 0.000000e+00 : f32
        %46 = vector.broadcast %cst_28 : f32 to vector<8x32xf32>
        %47 = arith.cmpf ogt, %41, %46 : vector<8x32xf32>
        %cst_29 = arith.constant 1.000000e+00 : f32
        %48 = vector.broadcast %cst_29 : f32 to vector<8x32xf32>
        %49 = arith.divf %48, %45 : vector<8x32xf32>
        %cst_30 = arith.constant 0.000000e+00 : f32
        %50 = vector.broadcast %cst_30 : f32 to vector<8x32xf32>
        %51 = arith.select %47, %49, %50 : vector<8x32xi1>, vector<8x32xf32>
        %52 = arith.truncf %51 : vector<8x32xf32> to vector<8x32xbf16>
        %c0_31 = arith.constant 0 : index
        %c0_32 = arith.constant 0 : index
        %53 = vector.load %arg17[%c0_31, %c0_32] : memref<8x32xbf16, #tpu.memory_space<vmem>>, vector<8x32xbf16>
        tpu.vector_store %arg17[%c0_31, %c0_32], %52 {strides = array<i32>} : memref<8x32xbf16, #tpu.memory_space<vmem>>, vector<8x32xbf16>,
      } else {
      }
      %17 = arith.index_cast %1 : i32 to index
      %c0_8 = arith.constant 0 : index
      %18 = vector.load %arg20[%17, %c0_8] : memref<48x32xf32, #tpu.memory_space<vmem>>, vector<48x32xf32>
      %c0_9 = arith.constant 0 : index
      %c0_10 = arith.constant 0 : index
      %19 = vector.load %arg19[%c0_9, %c0_10] : memref<1x32xf32, #tpu.memory_space<vmem>>, vector<1x32xf32>
      %20 = vector.broadcast %19 : vector<1x32xf32> to vector<48x32xf32>
      %21 = arith.subf %18, %20 : vector<48x32xf32>
      %22 = math.exp %21 : vector<48x32xf32>
      %c0_11 = arith.constant 0 : index
      %c0_12 = arith.constant 0 : index
      %23 = vector.load %arg17[%c0_11, %c0_12] : memref<8x32xbf16, #tpu.memory_space<vmem>>, vector<8x32xbf16>
      %cst = arith.constant dense<0.000000e+00> : vector<48x32xf32>
      %24 = tpu.matmul %2, %23, %cst {dimension_numbers = #tpu.dot_dimension_numbers<[1], [0], [0], [1], [0, 0, 1, 1], [], []>} : vector<48x8xbf16>, vector<8x32xbf16>, vector<48x32xf32> -> vector<48x32xf32>
      %25 = arith.mulf %22, %24 : vector<48x32xf32>
      %26 = arith.truncf %25 : vector<48x32xf32> to vector<48x32xbf16>
      %c0_13 = arith.constant 0 : index
      %c0_14 = arith.constant 0 : index
      %27 = vector.load %arg6[%c0_13, %c0_14] : memref<32x32xbf16, #tpu.memory_space<vmem>>, vector<32x32xbf16>
      %cst_15 = arith.constant dense<0.000000e+00> : vector<48x32xf32>
      %28 = tpu.matmul %26, %27, %cst_15 {dimension_numbers = #tpu.dot_dimension_numbers<[1], [0], [0], [1], [0, 0, 1, 1], [], []>} : vector<48x32xbf16>, vector<32x32xbf16>, vector<48x32xf32> -> vector<48x32xf32>
      %29 = arith.index_cast %1 : i32 to index
      %c0_16 = arith.constant 0 : index
      %30 = vector.load %arg21[%29, %c0_16] : memref<48x32xbf16, #tpu.memory_space<vmem>>, vector<48x32xbf16>
      %31 = arith.extf %30 : vector<48x32xbf16> to vector<48x32xf32>
      %32 = arith.mulf %31, %28 : vector<48x32xf32>
      %c0_17 = arith.constant 0 : index
      %c0_18 = arith.constant 0 : index
      %33 = vector.load %arg18[%c0_17, %c0_18] : memref<8x32xf32, #tpu.memory_space<vmem>>, vector<8x32xf32>
      %34 = arith.truncf %32 : vector<48x32xf32> to vector<48x32xbf16>
      %cst_19 = arith.constant dense<0.000000e+00> : vector<8x32xf32>
      %35 = tpu.matmul %2, %34, %cst_19 {dimension_numbers = #tpu.dot_dimension_numbers<[0], [0], [1], [1], [0, 1, 1, 1], [], []>} : vector<48x8xbf16>, vector<48x32xbf16>, vector<8x32xf32> -> vector<8x32xf32>
      %36 = arith.addf %33, %35 : vector<8x32xf32>
      %c0_20 = arith.constant 0 : index
      %c0_21 = arith.constant 0 : index
      %37 = vector.load %arg18[%c0_20, %c0_21] : memref<8x32xf32, #tpu.memory_space<vmem>>, vector<8x32xf32>
      tpu.vector_store %arg18[%c0_20, %c0_21], %36 {strides = array<i32>} : memref<8x32xf32, #tpu.memory_space<vmem>>, vector<8x32xf32>,
      %c0_i32_22 = arith.constant 0 : i32
      %38 = arith.cmpi eq, %arg1, %c0_i32_22 : i32
      %39 = arith.extui %38 : i1 to i32
      %c0_i32_23 = arith.constant 0 : i32
      %40 = arith.cmpi ne, %39, %c0_i32_23 : i32
      scf.if %40 {
        %c0_24 = arith.constant 0 : index
        %c0_25 = arith.constant 0 : index
        %41 = vector.load %arg11[%c0_24, %c0_25] : memref<4x32xf32, #tpu.memory_space<vmem>>, vector<4x32xf32>
        %c0_26 = arith.constant 0 : index
        %c0_27 = arith.constant 0 : index
        %42 = vector.load %arg18[%c0_26, %c0_27] : memref<8x32xf32, #tpu.memory_space<vmem>>, vector<8x32xf32>
        %43 = vector.extract_strided_slice %41 {offsets = [0, 0], sizes = [1, 32], strides = [1, 1]} : vector<4x32xf32> to vector<1x32xf32>
        %44 = vector.extract_strided_slice %41 {offsets = [1, 0], sizes = [1, 32], strides = [1, 1]} : vector<4x32xf32> to vector<1x32xf32>
        %cst_28 = arith.constant dense<0.000000e+00> : vector<8xf32>
        %45 = vector.multi_reduction <add>, %42, %cst_28 [1] : vector<8x32xf32> to vector<8xf32>
        %46 = vector.shape_cast %45 : vector<8xf32> to vector<8x1xf32>
        %cst_29 = arith.constant 3.200000e+01 : f32
        %47 = vector.broadcast %cst_29 : f32 to vector<8x1xf32>
        %48 = arith.divf %46, %47 : vector<8x1xf32>
        %49 = vector.broadcast %48 : vector<8x1xf32> to vector<8x32xf32>
        %50 = arith.subf %42, %49 : vector<8x32xf32>
        %51 = vector.broadcast %48 : vector<8x1xf32> to vector<8x32xf32>
        %52 = arith.subf %42, %51 : vector<8x32xf32>
        %53 = arith.mulf %50, %52 : vector<8x32xf32>
        %cst_30 = arith.constant dense<0.000000e+00> : vector<8xf32>
        %54 = vector.multi_reduction <add>, %53, %cst_30 [1] : vector<8x32xf32> to vector<8xf32>
        %55 = vector.shape_cast %54 : vector<8xf32> to vector<8x1xf32>
        %cst_31 = arith.constant 3.200000e+01 : f32
        %56 = vector.broadcast %cst_31 : f32 to vector<8x1xf32>
        %57 = arith.divf %55, %56 : vector<8x1xf32>
        %58 = vector.broadcast %48 : vector<8x1xf32> to vector<8x32xf32>
        %59 = arith.subf %42, %58 : vector<8x32xf32>
        %cst_32 = arith.constant 9.99999974E-6 : f32
        %60 = vector.broadcast %cst_32 : f32 to vector<8x1xf32>
        %61 = arith.addf %57, %60 : vector<8x1xf32>
        %62 = math.rsqrt %61 : vector<8x1xf32>
        %63 = vector.broadcast %62 : vector<8x1xf32> to vector<8x32xf32>
        %64 = arith.mulf %59, %63 : vector<8x32xf32>
        %65 = vector.broadcast %43 : vector<1x32xf32> to vector<8x32xf32>
        %66 = arith.mulf %64, %65 : vector<8x32xf32>
        %67 = vector.broadcast %44 : vector<1x32xf32> to vector<8x32xf32>
        %68 = arith.addf %66, %67 : vector<8x32xf32>
        %c0_33 = arith.constant 0 : index
        %c0_34 = arith.constant 0 : index
        %69 = vector.load %arg2[%c0_33, %c0_34] : memref<8x32xf32, #tpu.memory_space<vmem>>, vector<8x32xf32>
        %70 = arith.addf %68, %69 : vector<8x32xf32>
        %c0_35 = arith.constant 0 : index
        %c0_36 = arith.constant 0 : index
        %71 = vector.load %arg12[%c0_35, %c0_36] : memref<8x32xf32, #tpu.memory_space<vmem>>, vector<8x32xf32>
        tpu.vector_store %arg12[%c0_35, %c0_36], %70 {strides = array<i32>} : memref<8x32xf32, #tpu.memory_space<vmem>>, vector<8x32xf32>,
      } else {
      }
    } else {
    }
    return
  }
  func.func @transform_0(%arg0: i32, %arg1: i32) -> (i32, i32) {
    %c0_i32 = arith.constant 0 : i32
    %c0_i32_0 = arith.constant 0 : i32
    %c0_i32_1 = arith.constant 0 : i32
    return %c0_i32, %c0_i32_0 : i32, i32
  }
  func.func @transform_1(%arg0: i32, %arg1: i32) -> (i32, i32) {
    %c1_i32 = arith.constant 1 : i32
    %0 = arith.subi %c1_i32, %arg0 : i32
    %1 = arith.muli %arg1, %0 : i32
    %c0_i32 = arith.constant 0 : i32
    %2 = arith.muli %arg0, %c0_i32 : i32
    %3 = arith.addi %1, %2 : i32
    %c0_i32_0 = arith.constant 0 : i32
    %c0_i32_1 = arith.constant 0 : i32
    return %3, %c0_i32_0 : i32, i32
  }
  func.func @transform_2(%arg0: i32, %arg1: i32) -> (i32, i32) {
    %c1_i32 = arith.constant 1 : i32
    %0 = arith.subi %c1_i32, %arg0 : i32
    %1 = arith.muli %arg1, %0 : i32
    %c0_i32 = arith.constant 0 : i32
    %2 = arith.muli %arg0, %c0_i32 : i32
    %3 = arith.addi %1, %2 : i32
    %c0_i32_0 = arith.constant 0 : i32
    %c0_i32_1 = arith.constant 0 : i32
    return %3, %c0_i32_0 : i32, i32
  }
  func.func @transform_3(%arg0: i32, %arg1: i32) -> (i32, i32) {
    %c0_i32 = arith.constant 0 : i32
    %c0_i32_0 = arith.constant 0 : i32
    return %arg1, %c0_i32 : i32, i32
  }
  func.func @transform_4(%arg0: i32, %arg1: i32) -> (i32, i32) {
    %c0_i32 = arith.constant 0 : i32
    %c0_i32_0 = arith.constant 0 : i32
    %c0_i32_1 = arith.constant 0 : i32
    return %c0_i32, %c0_i32_0 : i32, i32
  }
  func.func @transform_5(%arg0: i32, %arg1: i32) -> (i32, i32) {
    %c0_i32 = arith.constant 0 : i32
    %c0_i32_0 = arith.constant 0 : i32
    %c0_i32_1 = arith.constant 0 : i32
    return %c0_i32, %c0_i32_0 : i32, i32
  }
  func.func @transform_6(%arg0: i32, %arg1: i32) -> (i32, i32) {
    %c0_i32 = arith.constant 0 : i32
    %c0_i32_0 = arith.constant 0 : i32
    %c0_i32_1 = arith.constant 0 : i32
    return %c0_i32, %c0_i32_0 : i32, i32
  }
  func.func @transform_7(%arg0: i32, %arg1: i32) -> (i32, i32) {
    %c0_i32 = arith.constant 0 : i32
    %c0_i32_0 = arith.constant 0 : i32
    %c0_i32_1 = arith.constant 0 : i32
    return %c0_i32, %c0_i32_0 : i32, i32
  }
  func.func @transform_8(%arg0: i32, %arg1: i32) -> (i32, i32) {
    %c0_i32 = arith.constant 0 : i32
    %c0_i32_0 = arith.constant 0 : i32
    %c0_i32_1 = arith.constant 0 : i32
    return %c0_i32, %c0_i32_0 : i32, i32
  }
  func.func @transform_9(%arg0: i32, %arg1: i32) -> (i32, i32) {
    %c0_i32 = arith.constant 0 : i32
    %c0_i32_0 = arith.constant 0 : i32
    %c0_i32_1 = arith.constant 0 : i32
    return %c0_i32, %c0_i32_0 : i32, i32
  }
  func.func @transform_10(%arg0: i32, %arg1: i32) -> (i32, i32) {
    %c0_i32 = arith.constant 0 : i32
    %c0_i32_0 = arith.constant 0 : i32
    %c0_i32_1 = arith.constant 0 : i32
    return %c0_i32, %c0_i32_0 : i32, i32
  }
  func.func @transform_11(%arg0: i32, %arg1: i32) -> (i32, i32) {
    %c1_i32 = arith.constant 1 : i32
    %0 = arith.subi %c1_i32, %arg0 : i32
    %1 = arith.muli %arg1, %0 : i32
    %c1_i32_0 = arith.constant 1 : i32
    %2 = arith.muli %arg0, %c1_i32_0 : i32
    %3 = arith.addi %1, %2 : i32
    %c0_i32 = arith.constant 0 : i32
    %c0_i32_1 = arith.constant 0 : i32
    return %3, %c0_i32 : i32, i32
  }
}

</mosaic_0001>

<bundles_post_ra>
// kernel: tpu_custom_call.1
= control target key start
LH: loop header
LB: loop body
LE: loop exit
PB: predicated region body
PF: predicated region fallthrough
CT: control target
= control target key end

     0   :  { %17 = vsyncpa [#allocation11], 0  ;;  %s2106_s17 = smov 0   ;;  %s2108_s18 = smov 0   ;;  %s2515_s0 = inlined_call_operand.vmem [shape: f32[8,32], index: 0, kind: input, shape index: {}]   ;;  %s2516_s1 = inlined_call_operand.vmem [shape: f32[48,32], index: 1, kind: input, shape index: {}]   ;;  %s2517_s2 = inlined_call_operand.vmem [shape: bf16[48,8], index: 2, kind: input, shape index: {}]   ;;  %s2518_s3 = inlined_call_operand.vmem [shape: bf16[48,8], index: 3, kind: input, shape index: {}]   ;;  %s2519_s4 = inlined_call_operand.vmem [shape: bf16[32,32], index: 4, kind: input, shape index: {}]   ;;  %s2520_s5 = inlined_call_operand.vmem [shape: f32[32,128], index: 5, kind: input, shape index: {}]   ;;  %s2521_s6 = inlined_call_operand.vmem [shape: f32[1,128], index: 6, kind: input, shape index: {}]   ;;  %s2522_s7 = inlined_call_operand.vmem [shape: f32[32,32], index: 7, kind: input, shape index: {}]   ;;  %s2523_s8 = inlined_call_operand.vmem [shape: f32[1,32], index: 8, kind: input, shape index: {}]   ;;  %s2524_s9 = inlined_call_operand.vmem [shape: f32[4,32], index: 9, kind: input, shape index: {}]   ;;  %s2525_s10 = inlined_call_operand.hbm [shape: f32[8,32], index: 10, kind: output, shape index: {0}]   ;;  %s2526_s11 = inlined_call_operand.vmem [shape: f32[96,32], index: 11, kind: output, shape index: {1}]  }
   0x1   :  { %s2110_s19 = smov 0  }
   0x2 LB: > { %s1677_s20 = sadd.s32 4294967295, %s2033_s19   ;;  %s35_s21 = sadd.s32 1, %s2029_s18  ;;  %s2033_s19 = sphi %s2110_s19, %s23_s19   ;;  %s2029_s18 = sphi %s2108_s18, %s2529_s18   ;;  %s2025_s17 = sphi %s2106_s17, %s2528_s17  }
   0x3   : > { %p37_p0 = scmp.ge.s32.totalorder %s35_s21, 2  ;;  %p1684_p1 = scmp.ge.s32.totalorder %s2033_s19, 1 }
   0x4   : > { %p393_p2 = scmp.lt.s32.totalorder %s2033_s19, 3 }
   0x5   : > { %s2531_s21 = smov (%p37_p0, %s35_s21), 0 }
   0x6   : > { %p394_p3 = pnand %p1684_p1, %p393_p2 }
   0x7   : > { %s479_s22 = smul.u32 (!%p394_p3), 6, %s2025_s17  ;;  %v2131_v0 = vld [vmem:[%s2518_s3] sm:$0xf] (!%p394_p3)  ;;  %v2136_v1 = vld [vmem:[%s2518_s3 + $0x4] sm:$0xf] (!%p394_p3)  ;;  %p496_p4 = scmp.eq.s32.totalorder (!%p394_p3), %s2025_s17, 0 }
   0x8   : > { %397 = sbr.rel (%p394_p3) target bundleno = 1984 (0x7c0), region = 60  ;;  %v2142_v2 = vld [vmem:[%s2518_s3 + $0x8] sm:$0xf] (!%p394_p3)  ;;  %v2147_v3 = vld [vmem:[%s2518_s3 + $0xc] sm:$0xf] (!%p394_p3) }
   0x9   : > { %v2152_v4 = vld [vmem:[%s2518_s3 + $0x10] sm:$0xf] (!%p394_p3)  ;;  %p480_p5 = scmp.lt.s32.totalorder (!%p394_p3), %s479_s22, 11  ;;  %v2157_v5 = vld [vmem:[%s2518_s3 + $0x14] sm:$0xf] (!%p394_p3) }
   0xf   : > { %s2533_s22 = smov (!%p480_p5, %s479_s22), 11  ;;  %501 = sbr.rel (!%p496_p4) target bundleno = 358 (0x166), region = 64 }
  0x10   : > { %s1685_s16 = sshll.u32 %s2533_s22, 3  ;;  %v503_v6 = vld [vmem:[%s2520_s5] sm:$0xff] (%p496_p4)  ;;  %v504_v7 = vld [vmem:[%s2520_s5 + $0x8] sm:$0xff] (%p496_p4)  ;;  %v505_v8 = vld [vmem:[%s2520_s5 + $0x10] sm:$0xff] (%p496_p4)  ;;  %v2035_v9 = vmov (%p496_p4), 0.0|0.0   ;;  %vm2036_vm0 = vmmov (%p496_p4), 0  }
  0x11   : > { %s2162_s25 = scalar_lea.vmem %s2526_s11, %s1685_s16  ;;  %1877 = vmatprep.subr.bf16.mxu0 (%p496_p4), %v2035_v9  ;;  %v1878_v10 = vpack.c.bf16 (%p496_p4), %v504_v7, %v503_v6  ;;  %v506_v11 = vld [vmem:[%s2520_s5 + $0x18] sm:$0xff] (%p496_p4)  ;;  %v2037_v12 = vmov (%p496_p4), 0.0   ;;  %vm514_vm1 = vcmask (%p496_p4), 261120   ;;  %v502_v14 = vld [vmem:[%s2515_s0] sm:$0xff] (%p496_p4)  ;;  %vm600_vm2 = vcmask (%p496_p4), 253952   ;;  %s2039_s24 = smov (%p496_p4), 96  }
  0x12   : > { %1779 = vmatprep.mubr.msk.f32.mxu0 (%p496_p4), %vm2036_vm0, %v2037_v12  ;;  %598 = vst.msk [vmem:[#allocation4] sm:$0xff] (%p496_p4), %vm514_vm1, %v2037_v12  ;;  %599 = vst.msk [vmem:[#allocation6] sm:$0xff] (%p496_p4), %vm514_vm1, %v2037_v12  ;;  %v1881_v13 = vpack.c.bf16 (%p496_p4), %v506_v11, %v505_v8  ;;  %v2038_v15 = vmov (%p496_p4), -1e+30   ;;  %v1687_v16 = vld [vmem:[%s2521_s6] ss:$0 sm:$0xff] (%p496_p4) }
  0x13   : > { %1879 = vmatpush3.bf16.msra.mxu0 (%p496_p4), %v1878_v10  ;;  %601 = vst.msk [vmem:[#allocation7] sm:$0x1] (%p496_p4), %vm600_vm2, %v2038_v15  ;;  %vm596_vm3 = vcmask (%p496_p4), 257024  }
  0x14   : > { %1880 = vmatprep.subr.bf16.mxu0 (%p496_p4), %v2035_v9 }
  0x17   : > { %1882 = vmatpush3.bf16.msra.mxu0 %v1881_v13 }
  0x1a   : > { %1780 = vmatmul.mubr.msk.f32.vlgmr.msra.gmra.mrb[0].mxu0 %vm514_vm1, %v502_v14 }
  0xed   : > { %v584_v17 = vpop.f32.mrb[0].mxu0 }
  0xee   : > { %v585_v18 = vadd.f32 %v1687_v16, %v584_v17  ;;  %v1781_v19 = vpop.f32.mrb[1].mxu0 }
  0xf0   : > { %v588_v20 = vpack.c.bf16 %v585_v18, %v585_v18 }
  0xf2   : > { %589 = vst [vmem:[#allocation2] sm:$0xf] %v588_v20  ;;  %593 = vrot.lane.b32.xlu0 %v588_v20, %s2039_s24 }
 0x164   : > { %v594_v21 = vpop.permute.xlu0 %593 }
 0x165   : > { %597 = vst.msk [vmem:[#allocation3] sm:$0xf] %vm596_vm3, %v594_v21 }
 0x166 PF: > { %p1690_p6 = scmp.ne.s32.totalorder %s2025_s17, 0 }
 0x167   : > { %v617_v22 = vld [vmem:[#allocation2] sm:$0xf] (!%p1690_p6)  ;;  %vm643_vm4 = vcmask (!%p1690_p6), 1043456   ;;  %v2040_v24 = vmov (!%p1690_p6), 0.0   ;;  %v1697_v28 = vcombine.low (!%p1690_p6), %v2131_v0, %v2136_v1  ;;  %vm633_vm5 = vcmask (!%p1690_p6), 64512   ;;  %v790_v30 = vld [vmem:[%s2522_s7 + $0x8] sm:$0xff] (!%p1690_p6) }
 0x168   : > { %604 = sbr.rel (%p1690_p6) target bundleno = 936 (0x3a8), region = 68  ;;  %1782 = vmatprep.subr.bf16.mxu0 (!%p1690_p6), %v2040_v24  ;;  %1796 = vmatprep.subr.bf16.mxu1 (!%p1690_p6), %v2040_v24  ;;  %v645_v25 = vsel (!%p1690_p6), %vm643_vm4, %v617_v22, 0  ;;  %v1934_v27 = vld [vmem:[%s2517_s2] sm:$0xff] (!%p1690_p6)   ;;  %vm2041_vm6 = vmmov (!%p1690_p6), 0   ;;  %v791_v32 = vld [vmem:[%s2522_s7 + $0x10] sm:$0xff] (!%p1690_p6)  ;;  %v792_v33 = vld [vmem:[%s2522_s7 + $0x18] sm:$0xff] (!%p1690_p6)  ;;  %v1698_v35 = vcombine.low (!%p1690_p6), %v2142_v2, %v2147_v3  ;;  %v1699_v37 = vcombine.low (!%p1690_p6), %v2152_v4, %v2157_v5 }
 0x169   : > { %1783 = vmatpush3.bf16.msra.mxu0 (!%p1690_p6), %v645_v25  ;;  %v789_v29 = vld [vmem:[%s2522_s7] sm:$0xff] (!%p1690_p6)  ;;  %1784 = vmatprep.mubr.msk.bf16.mxu0 (!%p1690_p6), %vm2041_vm6, %v2040_v24  ;;  %v1887_v34 = vpack.c.bf16 (!%p1690_p6), %v792_v33, %v791_v32  ;;  %v1935_v36 = vld [vmem:[%s2517_s2 + $0x8] sm:$0xff] (!%p1690_p6)   ;;  %v1936_v38 = vld [vmem:[%s2517_s2 + $0x10] sm:$0xff] (!%p1690_p6)   ;;  %vm800_vm7 = vcmask (!%p1690_p6), 261120   ;;  %vm1195_vm8 = vcmask (!%p1690_p6), 253952   ;;  %vm1149_vm9 = vcmask (!%p1690_p6), 392192  }
 0x16a   : > { %1798 = vmatprep.mubr.msk.bf16.mxu1 (!%p1690_p6), %vm2041_vm6, %v2040_v24  ;;  %v1883_v31 = vpack.c.bf16 (!%p1690_p6), %v790_v30, %v789_v29  ;;  %1133 = vxpose.xlu0.c.b16.start [1/3] (short) (narrow) (!%p1690_p6), %v1697_v28, 16  ;;  %v2232_v39 = vld [vmem:[%s2516_s1] sm:$0xff] (!%p1690_p6)  ;;  %v2243_v40 = vld [vmem:[%s2516_s1 + $0x8] sm:$0xff] (!%p1690_p6)  ;;  %v2248_v41 = vld [vmem:[%s2516_s1 + $0x10] sm:$0xff] (!%p1690_p6)  ;;  %s2042_s28 = smov (!%p1690_p6), 64  }
 0x16b   : > { %v2257_v42 = vld [vmem:[%s2516_s1 + $0x18] sm:$0xff] (!%p1690_p6)  ;;  %v2262_v43 = vld [vmem:[%s2516_s1 + $0x20] sm:$0xff] (!%p1690_p6)  ;;  %v2271_v44 = vld [vmem:[%s2516_s1 + $0x28] sm:$0xff] (!%p1690_p6) }
 0x16c   : > { %v704_v23 = vld [vmem:[#allocation3] sm:$0xf] (!%p1690_p6)  ;;  %1785 = vmatmul.mubr.msk.bf16.vlgmr.msra.gmra.mrb[0].mxu0 (!%p1690_p6), %vm633_vm5, %v1934_v27  ;;  %1884 = vmatprep.subr.bf16.mxu0 (!%p1690_p6), %v1883_v31  ;;  %v1703_v20 = vld [vmem:[%s2523_s8] ss:$0 sm:$0xff] (!%p1690_p6) }
 0x16d   : > { %v730_v26 = vsel (!%p1690_p6), %vm643_vm4, %v704_v23, 0  ;;  %1788 = vmatprep.mubr.msk.bf16.mxu0 (!%p1690_p6), %vm2041_vm6, %v2040_v24  ;;  %1886 = vmatpush3.bf16.msra.mxu0 (!%p1690_p6), %v1883_v31 }
 0x16e   : > { %1797 = vmatpush3.bf16.msra.mxu1 (!%p1690_p6), %v730_v26  ;;  %1888 = vmatprep.subr.bf16.mxu0 (!%p1690_p6), %v1887_v34 }
 0x16f   : > { %1827 = vmatprep.subr.bf16.mxu1 %v2040_v24  ;;  %1134 = vxpose.xlu0.c.b16.cont [2/3] (short) (narrow) %v1698_v35, 16 }
 0x171   : > { %1799 = vmatmul.mubr.msk.bf16.vlgmr.msra.gmra.mrb[0].mxu1 %vm633_vm5, %v1697_v28  ;;  %1890 = vmatpush3.bf16.msra.mxu0 %v1887_v34 }
 0x172   : > { %1802 = vmatprep.mubr.msk.bf16.mxu1 %vm2041_vm6, %v2040_v24 }
 0x173   : > { %1135 = vxpose.xlu0.c.b16.end [3/3] (short) (narrow) %v1699_v37, 16 }
 0x174   : > { %1789 = vmatmul.mubr.msk.bf16.gmra.mrb[4].mxu0 %vm633_vm5, %v1935_v36 }
 0x175   : > { %1792 = vmatprep.mubr.msk.bf16.mxu0 %vm2041_vm6, %v2040_v24 }
 0x179   : > { %1803 = vmatmul.mubr.msk.bf16.gmra.mrb[4].mxu1 %vm633_vm5, %v1698_v35 }
 0x17a   : > { %1806 = vmatprep.mubr.msk.bf16.mxu1 %vm2041_vm6, %v2040_v24 }
 0x17c   : > { %1793 = vmatmul.mubr.msk.bf16.gmra.mrb[8].mxu0 %vm633_vm5, %v1936_v38 }
 0x17d   : > { %1818 = vmatprep.mubr.msk.f32.mxu0 %vm800_vm7, %v2232_v39 }
 0x181   : > { %1807 = vmatmul.mubr.msk.bf16.gmra.mrb[8].mxu1 %vm633_vm5, %v1699_v37 }
 0x182   : > { %1833 = vmatprep.mubr.msk.bf16.mxu1 %vm2041_vm6, %v2040_v24 }
 0x184   : > { %1819 = vmatmul.mubr.msk.f32.vlgmr.msra.gmra.mrb[12].mxu0 %vm800_vm7, %v2243_v40 }
 0x185   : > { %1821 = vmatprep.mubr.msk.f32.mxu0 %vm800_vm7, %v2248_v41 }
 0x188   : > { %1822 = vmatmul.mubr.msk.f32.gmra.mrb[14].mxu0 %vm800_vm7, %v2257_v42 }
 0x189   : > { %1824 = vmatprep.mubr.msk.f32.mxu0 %vm800_vm7, %v2262_v43 }
 0x18c   : > { %1825 = vmatmul.mubr.msk.f32.gmra.mrb[16].mxu0 %vm800_vm7, %v2271_v44 }
 0x23f   : > { %v2275_v45 = vpop.f32.mrb[0].mxu0 }
 0x240   : > { %v1786_v48 = vpop.f32.mrb[1].mxu0 }
 0x241   : > { %v2278_v50 = vpop.f32.mrb[2].mxu0 }
 0x242   : > { %v1051_v52 = vpack.c.bf16 %v2278_v50, %v2275_v45  ;;  %v1787_v54 = vpop.f32.mrb[3].mxu0 }
 0x244   : > { %v766_v46 = vpop.f32.mrb[0].mxu1 }
 0x245   : > { %v914_v47 = vmul.f32 %v766_v46, %v2275_v45  ;;  %v1800_v49 = vpop.f32.mrb[1].mxu1 }
 0x246   : > { %v769_v51 = vpop.f32.mrb[2].mxu1 }
 0x247   : > { %v915_v53 = vmul.f32 %v769_v51, %v2278_v50  ;;  %v1801_v55 = vpop.f32.mrb[3].mxu1  ;;  %v2283_v56 = vpop.f32.mrb[4].mxu0 }
 0x248   : > { %v1790_v59 = vpop.f32.mrb[5].mxu0 }
 0x249   : > { %v2286_v61 = vpop.f32.mrb[6].mxu0 }
 0x24a   : > { %v1052_v63 = vpack.c.bf16 %v2286_v61, %v2283_v56  ;;  %v1791_v7 = vpop.f32.mrb[7].mxu0 }
 0x24c   : > { %v774_v57 = vpop.f32.mrb[4].mxu1 }
 0x24d   : > { %v916_v58 = vmul.f32 %v774_v57, %v2283_v56  ;;  %v1804_v60 = vpop.f32.mrb[5].mxu1 }
 0x24e   : > { %v777_v62 = vpop.f32.mrb[6].mxu1 }
 0x24f   : > { %v917_v6 = vmul.f32 %v777_v62, %v2286_v61  ;;  %v1805_v8 = vpop.f32.mrb[7].mxu1  ;;  %v2291_v9 = vpop.f32.mrb[8].mxu0 }
 0x250   : > { %v1794_v12 = vpop.f32.mrb[9].mxu0 }
 0x251   : > { %v2294_v14 = vpop.f32.mrb[10].mxu0 }
 0x252   : > { %v1053_v16 = vpack.c.bf16 %v2294_v14, %v2291_v9  ;;  %v1795_v18 = vpop.f32.mrb[11].mxu0 }
 0x254   : > { %v782_v10 = vpop.f32.mrb[8].mxu1 }
 0x255   : > { %v918_v11 = vmul.f32 %v782_v10, %v2291_v9  ;;  %v1808_v13 = vpop.f32.mrb[9].mxu1 }
 0x256   : > { %v785_v15 = vpop.f32.mrb[10].mxu1 }
 0x257   : > { %v919_v17 = vmul.f32 %v785_v15, %v2294_v14  ;;  %v1809_v19 = vpop.f32.mrb[11].mxu1  ;;  %v1820_v21 = vpop.f32.mrb[12].mxu0 }
 0x258   : > { %v891_v22 = vadd.f32 %v1820_v21, %v1703_v20  ;;  %v885_v23 = vpop.f32.mrb[13].mxu0  ;;  %v1012_v21 = vlaneseq }
 0x259   : > { %v886_v25 = vadd.f32 %v1703_v20, %v885_v23 }
 0x25a   : > { %v2302_v26 = vadd.f32 %v915_v53, %v891_v22 }
 0x25b   : > { %v2304_v27 = vadd.f32 %v914_v47, %v886_v25  ;;  %v1823_v28 = vpop.f32.mrb[14].mxu0  ;;  %v2348_v25 = vshrl.u32 %v1012_v21, 7  ;;  %v1141_v21 = vpop.trf.xlu0 }
 0x25c   : > { %v2307_v29 = vmul.f32 0.35355338, %v2302_v26  ;;  %v901_v30 = vadd.f32 %v1823_v28, %v1703_v20  ;;  %v895_v31 = vpop.f32.mrb[15].mxu0  ;;  %v936_v32 = vsel %vm800_vm7, %v2302_v26, 0.0 }
 0x25d   : > { %v926_v33 = vmul.f32 0.35355338, %v2304_v27  ;;  %v896_v34 = vadd.f32 %v1703_v20, %v895_v31  ;;  %937 = vadd.xlane.f32.xlu1 %v936_v32  ;;  %v933_v49 = vsel %vm800_vm7, %v2304_v27, 0.0  ;;  %v1073_v31 = vld [vmem:[#allocation7] sm:$0x1] }
 0x25e   : > { %1046 = vst.msk [vmem:[#allocation8 + $0x8] sm:$0xff] %vm800_vm7, %v2307_v29  ;;  %v2314_v35 = vadd.f32 %v917_v6, %v901_v30  ;;  %v1075_v60 = vsel %vm800_vm7, %v2307_v29, -inf }
 0x25f   : > { %1045 = vst.msk [vmem:[#allocation8] sm:$0xff] %vm800_vm7, %v926_v33  ;;  %v2317_v36 = vadd.f32 %v916_v58, %v896_v34  ;;  %v1826_v37 = vpop.f32.mrb[16].mxu0  ;;  %v1074_v62 = vsel %vm800_vm7, %v926_v33, -inf  ;;  %v1095_v34 = vsub.s32 0, %v2348_v25 }
 0x260   : > { %v929_v38 = vmul.f32 0.35355338, %v2314_v35  ;;  %v911_v46 = vadd.f32 %v1826_v37, %v1703_v20  ;;  %v905_v47 = vpop.f32.mrb[17].mxu0  ;;  %v942_v48 = vsel %vm800_vm7, %v2314_v35, 0.0 }
 0x261   : > { %v928_v51 = vmul.f32 0.35355338, %v2317_v36  ;;  %v906_v53 = vadd.f32 %v1703_v20, %v905_v47  ;;  %943 = vadd.xlane.f32.xlu0 %v942_v48  ;;  %934 = vadd.xlane.f32.xlu1 %v933_v49  ;;  %v939_v58 = vsel %vm800_vm7, %v2317_v36, 0.0 }
 0x262   : > { %1048 = vst.msk [vmem:[#allocation8 + $0x18] sm:$0xff] %vm800_vm7, %v929_v38  ;;  %v2326_v54 = vadd.f32 %v919_v17, %v911_v46  ;;  %v1077_v7 = vsel %vm800_vm7, %v929_v38, -inf }
 0x263   : > { %1047 = vst.msk [vmem:[#allocation8 + $0x10] sm:$0xff] %vm800_vm7, %v928_v51  ;;  %v2329_v55 = vadd.f32 %v918_v11, %v906_v53  ;;  %v1076_v8 = vsel %vm800_vm7, %v928_v51, -inf }
 0x264   : > { %v931_v57 = vmul.f32 0.35355338, %v2326_v54  ;;  %v1083_v15 = vmax.f32 %v1076_v8, %v1077_v7  ;;  %v948_v19 = vsel %vm800_vm7, %v2326_v54, 0.0 }
 0x265   : > { %v930_v59 = vmul.f32 0.35355338, %v2329_v55  ;;  %940 = vadd.xlane.f32.xlu1 %v939_v58  ;;  %v945_v13 = vsel %vm800_vm7, %v2329_v55, 0.0 }
 0x266   : > { %1050 = vst.msk [vmem:[#allocation8 + $0x28] sm:$0xff] %vm800_vm7, %v931_v57  ;;  %v1080_v6 = vsel %vm800_vm7, %v931_v57, -inf }
 0x267   : > { %v1081_v10 = vmax.f32 %v1075_v60, %v1080_v6  ;;  %1049 = vst.msk [vmem:[#allocation8 + $0x20] sm:$0xff] %vm800_vm7, %v930_v59  ;;  %v1078_v11 = vsel %vm800_vm7, %v930_v59, -inf }
 0x268   : > { %v1079_v12 = vmax.f32 %v1074_v62, %v1078_v11 }
 0x269   : > { %946 = vadd.xlane.f32.xlu1 %v945_v13 }
 0x26a   : > { %v1082_v17 = vmax.f32 %v1079_v12, %v1081_v10 }
 0x26c   : > { %v1084_v18 = vmax.f32 %v1082_v17, %v1083_v15 }
 0x26d   : > { %949 = vadd.xlane.f32.xlu1 %v948_v19 }
 0x26e   : > { %v1085_v20 = vrot.slane %v1084_v18, 4 }
 0x270   : > { %v1086_v22 = vmax.f32 %v1084_v18, %v1085_v20 }
 0x272   : > { %v1087_v23 = vrot.slane %v1086_v22, 2 }
 0x274   : > { %v1088_v28 = vmax.f32 %v1086_v22, %v1087_v23 }
 0x276   : > { %v1089_v30 = vrot.slane %v1088_v28, 1 }
 0x278   : > { %v1090_v32 = vmax.f32 %v1088_v28, %v1089_v30 }
 0x27a   : > { %v1091_v37 = vmax.f32 %v1073_v31, %v1090_v32 }
 0x27c   : > { %v1096_v46 = vrot.slane %v1091_v37, %v1095_v34  ;;  %1196 = vst.msk [vmem:[#allocation7] sm:$0x1] %vm1195_vm8, %v1091_v37  ;;  %v1117_v47 = vsub.f32 %v1073_v31, %v1091_v37 }
 0x27e   : > { %v1098_v48 = vsub.f32 %v926_v33, %v1096_v46  ;;  %v1099_v49 = vsub.f32 %v2307_v29, %v1096_v46  ;;  %v1100_v53 = vsub.f32 %v928_v51, %v1096_v46  ;;  %v1101_v58 = vsub.f32 %v929_v38, %v1096_v46 }
 0x27f   : > { %v1118_v60 = vmul.f32 1.442695, %v1117_v47  ;;  %v1102_v7 = vsub.f32 %v930_v59, %v1096_v46  ;;  %v1103_v11 = vsub.f32 %v931_v57, %v1096_v46 }
 0x280   : > { %v1104_v62 = vmul.f32 1.442695, %v1098_v48  ;;  %v1106_v6 = vmul.f32 1.442695, %v1099_v49  ;;  %v1108_v8 = vmul.f32 1.442695, %v1100_v53 }
 0x281   : > { %1937 = vpow2.f32 %v1118_v60  ;;  %v1110_v10 = vmul.f32 1.442695, %v1101_v58  ;;  %v1112_v12 = vmul.f32 1.442695, %v1102_v7  ;;  %v1114_v13 = vmul.f32 1.442695, %v1103_v11 }
 0x282   : > { %1939 = vpow2.f32 %v1104_v62 }
 0x283   : > { %1941 = vpow2.f32 %v1106_v6 }
 0x284   : > { %1943 = vpow2.f32 %v1108_v8 }
 0x285   : > { %1945 = vpow2.f32 %v1110_v10 }
 0x286   : > { %1947 = vpow2.f32 %v1112_v12 }
 0x287   : > { %1949 = vpow2.f32 %v1114_v13 }
 0x28b   : > { %v1938_v33 = vpop.eup %1937 }
 0x28c   : > { %v1124_v29 = vrot.slane %v1938_v33, %v1095_v34  ;;  %v1940_v51 = vpop.eup %1939 }
 0x28d   : > { %v1942_v38 = vpop.eup %1941 }
 0x28e   : > { %v1944_v15 = vpop.eup %1943  ;;  %v1127_v17 = vpack.c.bf16 %v1942_v38, %v1940_v51 }
 0x28f   : > { %v1946_v18 = vpop.eup %1945 }
 0x290   : > { %1828 = vmatpush3.bf16.msra.mxu1 %v1127_v17  ;;  %v1948_v59 = vpop.eup %1947  ;;  %v1128_v57 = vpack.c.bf16 %v1946_v18, %v1944_v15 }
 0x291   : > { %1829 = vmatprep.subr.bf16.mxu1 %v2040_v24  ;;  %v1950_v19 = vpop.eup %1949 }
 0x292   : > { %v1129_v20 = vpack.c.bf16 %v1950_v19, %v1948_v59 }
 0x294   : > { %1830 = vmatpush3.bf16.msra.mxu1 %v1128_v57 }
 0x295   : > { %1831 = vmatprep.subr.bf16.mxu1 %v2040_v24 }
 0x298   : > { %1832 = vmatpush3.bf16.msra.mxu1 %v1129_v20 }
 0x29b   : > { %1834 = vmatmul.mubr.msk.bf16.vlgmr.msra.gmra.mrb[12].mxu1 %vm1149_vm9, %v1141_v21 }
 0x2ea   : > { %v938_v22 = vpop.xlane.xlu1 %937 }
 0x2eb   : > { %v953_v23 = vmul.f32 0.03125, %v938_v22  ;;  %v1024_v22 = vsub.s32 3, %v2348_v25 }
 0x2ed   : > { %v2355_v28 = vsub.f32 %v2302_v26, %v953_v23 }
 0x2ee   : > { %v944_v30 = vpop.xlane.xlu0 %943  ;;  %v935_v31 = vpop.xlane.xlu1 %934 }
 0x2ef   : > { %v955_v32 = vmul.f32 0.03125, %v944_v30  ;;  %v952_v34 = vmul.f32 0.03125, %v935_v31  ;;  %v965_v37 = vmul.f32 %v2355_v28, %v2355_v28 }
 0x2f1   : > { %v2360_v46 = vsub.f32 %v2314_v35, %v955_v32  ;;  %v2363_v24 = vsub.f32 %v2304_v27, %v952_v34  ;;  %v973_v47 = vsel %vm800_vm7, %v965_v37, 0.0 }
 0x2f2   : > { %974 = vadd.xlane.f32.xlu1 %v973_v47  ;;  %v941_v48 = vpop.xlane.xlu1 %940 }
 0x2f3   : > { %v954_v49 = vmul.f32 0.03125, %v941_v48  ;;  %v964_v26 = vmul.f32 %v2363_v24, %v2363_v24  ;;  %v967_v35 = vmul.f32 %v2360_v46, %v2360_v46 }
 0x2f5   : > { %v2369_v53 = vsub.f32 %v2317_v36, %v954_v49  ;;  %v970_v58 = vsel %vm800_vm7, %v964_v26, 0.0  ;;  %v979_v7 = vsel %vm800_vm7, %v967_v35, 0.0 }
 0x2f6   : > { %971 = vadd.xlane.f32.xlu1 %v970_v58  ;;  %v947_v60 = vpop.xlane.xlu1 %946 }
 0x2f7   : > { %v956_v27 = vmul.f32 0.03125, %v947_v60  ;;  %v966_v62 = vmul.f32 %v2369_v53, %v2369_v53 }
 0x2f9   : > { %v2377_v6 = vsub.f32 %v2329_v55, %v956_v27  ;;  %v976_v8 = vsel %vm800_vm7, %v966_v62, 0.0 }
 0x2fa   : > { %980 = vadd.xlane.f32.xlu1 %v979_v7  ;;  %977 = vadd.xlane.f32.xlu0 %v976_v8  ;;  %v950_v36 = vpop.xlane.xlu1 %949 }
 0x2fb   : > { %v957_v10 = vmul.f32 0.03125, %v950_v36  ;;  %v968_v11 = vmul.f32 %v2377_v6, %v2377_v6 }
 0x2fd   : > { %v2384_v12 = vsub.f32 %v2326_v54, %v957_v10  ;;  %v982_v13 = vsel %vm800_vm7, %v968_v11, 0.0  ;;  %v1116_v54 = vld [vmem:[#allocation4] sm:$0xff] }
 0x2fe   : > { %983 = vadd.xlane.f32.xlu0 %v982_v13  ;;  %v1126_v51 = vmul.f32 %v1124_v29, %v1116_v54  ;;  %v932_v29 = vld [vmem:[%s2524_s9] sm:$0xf] }
 0x2ff   : > { %v969_v55 = vmul.f32 %v2384_v12, %v2384_v12  ;;  %v1025_v37 = vrot.slane %v932_v29, %v1024_v22 }
 0x301   : > { %v985_v33 = vsel %vm800_vm7, %v969_v55, 0.0 }
 0x302   : > { %986 = vadd.xlane.f32.xlu1 %v985_v33 }
 0x313   : > { %1059 = vrot.lane.b32.xlu1 %v1052_v63, %s2042_s28 }
 0x314   : > { %1057 = vrot.lane.b32.xlu0 %v1051_v52, %s2042_s28 }
 0x317   : > { %1061 = vrot.lane.b32.xlu1 %v1053_v16, %s2042_s28  ;;  %v1014_v16 = vsub.s32 2, %v2348_v25 }
 0x319   : > { %v1015_v31 = vrot.slane %v932_v29, %v1014_v16 }
 0x36e   : > { %v1187_v38 = vpop.f32.mrb[12].mxu1 }
 0x36f   : > { %v1193_v15 = vadd.f32 %v1187_v38, %v1126_v51  ;;  %v1835_v17 = vpop.f32.mrb[13].mxu1 }
 0x370   : > { %v1190_v18 = vpop.f32.mrb[14].mxu1 }
 0x371   : > { %1194 = vst.msk [vmem:[#allocation4] sm:$0xff] %vm800_vm7, %v1193_v15  ;;  %v1836_v59 = vpop.f32.mrb[15].mxu1 }
 0x37f   : > { %v975_v57 = vpop.xlane.xlu1 %974 }
 0x380   : > { %v989_v56 = vmul.f32 0.03125, %v975_v57 }
 0x382   : > { %v995_v61 = vadd.f32 1e-05, %v989_v56 }
 0x383   : > { %v972_v63 = vpop.xlane.xlu1 %971 }
 0x384   : > { %1951 = vrsqrt.f32 %v995_v61  ;;  %v988_v45 = vmul.f32 0.03125, %v972_v63 }
 0x386   : > { %v994_v50 = vadd.f32 1e-05, %v988_v45 }
 0x387   : > { %v978_v52 = vpop.xlane.xlu0 %977  ;;  %v981_v19 = vpop.xlane.xlu1 %980 }
 0x388   : > { %1953 = vrsqrt.f32 %v994_v50  ;;  %v990_v9 = vmul.f32 0.03125, %v978_v52  ;;  %v991_v14 = vmul.f32 0.03125, %v981_v19 }
 0x38a   : > { %v996_v20 = vadd.f32 1e-05, %v990_v9  ;;  %v997_v21 = vadd.f32 1e-05, %v991_v14 }
 0x38b   : > { %v984_v23 = vpop.xlane.xlu0 %983 }
 0x38c   : > { %1955 = vrsqrt.f32 %v996_v20  ;;  %v992_v30 = vmul.f32 0.03125, %v984_v23 }
 0x38d   : > { %1957 = vrsqrt.f32 %v997_v21 }
 0x38e   : > { %v1952_v32 = vpop.eup %1951  ;;  %v998_v34 = vadd.f32 1e-05, %v992_v30 }
 0x38f   : > { %v1007_v47 = vmul.f32 %v1952_v32, %v2355_v28  ;;  %v1058_v48 = vpop.permute.xlu0 %1057  ;;  %v987_v49 = vpop.xlane.xlu1 %986 }
 0x390   : > { %1959 = vrsqrt.f32 %v998_v34  ;;  %1070 = vst.msk [vmem:[#allocation9] sm:$0xff] %vm800_vm7, %v1058_v48  ;;  %v993_v26 = vmul.f32 0.03125, %v987_v49 }
 0x391   : > { %v1017_v58 = vmul.f32 %v1015_v31, %v1007_v47 }
 0x392   : > { %v1954_v35 = vpop.eup %1953  ;;  %v999_v25 = vadd.f32 1e-05, %v993_v26 }
 0x393   : > { %v1027_v60 = vadd.f32 %v1025_v37, %v1017_v58  ;;  %v1006_v27 = vmul.f32 %v1954_v35, %v2363_v24  ;;  %v1060_v62 = vpop.permute.xlu1 %1059 }
 0x394   : > { %1961 = vrsqrt.f32 %v999_v25  ;;  %1071 = vst.msk [vmem:[#allocation9 + $0x8] sm:$0xff] %vm800_vm7, %v1060_v62 }
 0x395   : > { %v1033_v28 = vadd.f32 %v1027_v60, %v2243_v40  ;;  %v1016_v7 = vmul.f32 %v1015_v31, %v1006_v27 }
 0x396   : > { %v1956_v8 = vpop.eup %1955 }
 0x397   : > { %v1958_v36 = vpop.eup %1957  ;;  %1039 = vst.msk [vmem:[%s2162_s25 + $0x8] sm:$0xff] %vm800_vm7, %v1033_v28  ;;  %v1026_v10 = vadd.f32 %v1025_v37, %v1016_v7  ;;  %v1008_v11 = vmul.f32 %v1956_v8, %v2369_v53  ;;  %v1062_v13 = vpop.permute.xlu1 %1061 }
 0x398   : > { %v1009_v55 = vmul.f32 %v1958_v36, %v2360_v46  ;;  %1072 = vst.msk [vmem:[#allocation9 + $0x10] sm:$0xff] %vm800_vm7, %v1062_v13 }
 0x399   : > { %v1032_v24 = vadd.f32 %v1026_v10, %v2232_v39  ;;  %v1018_v33 = vmul.f32 %v1015_v31, %v1008_v11 }
 0x39a   : > { %v1960_v54 = vpop.eup %1959  ;;  %v1019_v40 = vmul.f32 %v1015_v31, %v1009_v55 }
 0x39b   : > { %1038 = vst.msk [vmem:[%s2162_s25] sm:$0xff] %vm800_vm7, %v1032_v24  ;;  %v1028_v51 = vadd.f32 %v1025_v37, %v1018_v33  ;;  %v1010_v38 = vmul.f32 %v1960_v54, %v2377_v6 }
 0x39c   : > { %v1029_v53 = vadd.f32 %v1025_v37, %v1019_v40 }
 0x39d   : > { %v1034_v15 = vadd.f32 %v1028_v51, %v2248_v41  ;;  %v1020_v17 = vmul.f32 %v1015_v31, %v1010_v38 }
 0x39e   : > { %v1962_v46 = vpop.eup %1961  ;;  %v1035_v18 = vadd.f32 %v1029_v53, %v2257_v42 }
 0x39f   : > { %1040 = vst.msk [vmem:[%s2162_s25 + $0x10] sm:$0xff] %vm800_vm7, %v1034_v15  ;;  %v1030_v39 = vadd.f32 %v1025_v37, %v1020_v17  ;;  %v1011_v59 = vmul.f32 %v1962_v46, %v2384_v12 }
 0x3a0   : > { %1041 = vst.msk [vmem:[%s2162_s25 + $0x18] sm:$0xff] %vm800_vm7, %v1035_v18 }
 0x3a1   : > { %v1036_v57 = vadd.f32 %v1030_v39, %v2262_v43  ;;  %v1021_v56 = vmul.f32 %v1015_v31, %v1011_v59 }
 0x3a3   : > { %1042 = vst.msk [vmem:[%s2162_s25 + $0x20] sm:$0xff] %vm800_vm7, %v1036_v57  ;;  %v1031_v6 = vadd.f32 %v1025_v37, %v1021_v56 }
 0x3a5   : > { %v1037_v61 = vadd.f32 %v1031_v6, %v2271_v44 }
 0x3a7   : > { %1043 = vst.msk [vmem:[%s2162_s25 + $0x28] sm:$0xff] %vm800_vm7, %v1037_v61 }
 0x3a8 PF: > { %p1711_p7 = scmp.ne.s32.totalorder %s2025_s17, 1 }
 0x3a9   : > { %v1204_v41 = vld [vmem:[#allocation4] sm:$0xff] (!%p1711_p7)  ;;  %v2043_v42 = vmov (!%p1711_p7), 0.0   ;;  %vm2044_vm11 = vmmov (!%p1711_p7), 0   ;;  %v1713_v43 = vcombine.low (!%p1711_p7), %v2131_v0, %v2136_v1  ;;  %v1714_v44 = vcombine.low (!%p1711_p7), %v2142_v2, %v2147_v3  ;;  %v1963_v2 = vld [vmem:[%s2519_s4] sm:$0xff] (!%p1711_p7)   ;;  %v1217_v21 = vld [vmem:[#allocation8 + $0x18] sm:$0xff] (!%p1711_p7) }
 0x3aa   : > { %1200 = sbr.rel (%p1711_p7) target bundleno = 1959 (0x7a7), region = 72  ;;  %1837 = vmatprep.subr.bf16.mxu0 (!%p1711_p7), %v2043_v42  ;;  %vm1205_vm10 = vcmp.gt.f32.partialorder (!%p1711_p7), %v1204_v41, 0.0  ;;  %1839 = vmatprep.mubr.msk.bf16.mxu0 (!%p1711_p7), %vm2044_vm11, %v2043_v42  ;;  %v1715_v63 = vcombine.low (!%p1711_p7), %v2152_v4, %v2157_v5  ;;  %vm1211_vm12 = vcmask (!%p1711_p7), 257024   ;;  %vm1271_vm13 = vcmask (!%p1711_p7), 1043456   ;;  %v1964_v3 = vld [vmem:[%s2519_s4 + $0x8] sm:$0xff] (!%p1711_p7)   ;;  %v1214_v4 = vld [vmem:[#allocation8] sm:$0xff] (!%p1711_p7) }
 0x3ab   : > { %v1206_v12 = vsel (!%p1711_p7), %vm1205_vm10, %v1204_v41, 1.0  ;;  %1851 = vmatprep.subr.bf16.mxu1 (!%p1711_p7), %v2043_v42  ;;  %1855 = vmatprep.mubr.msk.bf16.mxu1 (!%p1711_p7), %vm2044_vm11, %v2043_v42  ;;  %vm1261_vm14 = vcmask (!%p1711_p7), 64512   ;;  %v1712_v5 = vld [vmem:[#allocation7] ss:$0 sm:$0xff] (!%p1711_p7)  ;;  %v1215_v19 = vld [vmem:[#allocation8 + $0x8] sm:$0xff] (!%p1711_p7)  ;;  %v1216_v20 = vld [vmem:[#allocation8 + $0x10] sm:$0xff] (!%p1711_p7) }
 0x3ac   : > { %1965 = vrcp.f32 (!%p1711_p7), %v1206_v12  ;;  %1450 = vxpose.xlu0.c.b16.start [1/3] (short) (narrow) (!%p1711_p7), %v1713_v43, 16  ;;  %1852 = vmatpush3.bf16.msra.mxu1 (!%p1711_p7), %v1963_v2  ;;  %v1227_v9 = vsub.f32 (!%p1711_p7), %v1214_v4, %v1712_v5  ;;  %v1228_v14 = vsub.f32 (!%p1711_p7), %v1215_v19, %v1712_v5  ;;  %v1229_v22 = vsub.f32 (!%p1711_p7), %v1216_v20, %v1712_v5  ;;  %v1218_v32 = vld [vmem:[#allocation8 + $0x20] sm:$0xff] (!%p1711_p7)  ;;  %v1219_v34 = vld [vmem:[#allocation8 + $0x28] sm:$0xff] (!%p1711_p7)  ;;  %v1428_v59 = vld [vmem:[#allocation9] sm:$0xff] (!%p1711_p7) }
 0x3ad   : > { %1853 = vmatprep.subr.bf16.mxu1 (!%p1711_p7), %v2043_v42  ;;  %v1230_v23 = vsub.f32 (!%p1711_p7), %v1217_v21, %v1712_v5  ;;  %v1231_v37 = vsub.f32 (!%p1711_p7), %v1218_v32, %v1712_v5  ;;  %v1232_v47 = vsub.f32 (!%p1711_p7), %v1219_v34, %v1712_v5  ;;  %vm1357_vm15 = vcmask (!%p1711_p7), 261120   ;;  %v1430_v19 = vld [vmem:[#allocation9 + $0x10] sm:$0xff] (!%p1711_p7)  ;;  %v1443_v34 = vld [vmem:[#allocation6] sm:$0xff] (!%p1711_p7) }
 0x3ae   : > { %v1233_v16 = vmul.f32 (!%p1711_p7), 1.442695, %v1227_v9  ;;  %v1235_v29 = vmul.f32 (!%p1711_p7), 1.442695, %v1228_v14  ;;  %v1237_v30 = vmul.f32 (!%p1711_p7), 1.442695, %v1229_v22  ;;  %v1431_v57 = vunpack.c.l.bf16 (!%p1711_p7), %v1428_v59 }
 0x3af   : > { %v1239_v31 = vmul.f32 (!%p1711_p7), 1.442695, %v1230_v23  ;;  %v1241_v35 = vmul.f32 (!%p1711_p7), 1.442695, %v1231_v37  ;;  %v1243_v60 = vmul.f32 (!%p1711_p7), 1.442695, %v1232_v47  ;;  %v1432_v56 = vunpack.c.h.bf16 (!%p1711_p7), %v1428_v59 }
 0x3b0   : > { %1451 = vxpose.xlu0.c.b16.cont [2/3] (short) (narrow) (!%p1711_p7), %v1714_v44, 16  ;;  %1854 = vmatpush3.bf16.msra.mxu1 (!%p1711_p7), %v1964_v3  ;;  %1967 = vpow2.f32 (!%p1711_p7), %v1233_v16  ;;  %v1435_v14 = vunpack.c.l.bf16 (!%p1711_p7), %v1430_v19  ;;  %v1436_v16 = vunpack.c.h.bf16 (!%p1711_p7), %v1430_v19  ;;  %vm1466_vm0 = vcmask (!%p1711_p7), 392192  }
 0x3b1   : > { %1969 = vpow2.f32 %v1235_v29 }
 0x3b2   : > { %1971 = vpow2.f32 %v1237_v30 }
 0x3b3   : > { %1973 = vpow2.f32 %v1239_v31 }
 0x3b4   : > { %1452 = vxpose.xlu0.c.b16.end [3/3] (short) (narrow) %v1715_v63, 16  ;;  %1975 = vpow2.f32 %v1241_v35 }
 0x3b5   : > { %1977 = vpow2.f32 %v1243_v60 }
 0x3b6   : > { %v1966_v45 = vpop.eup %1965 }
 0x3b7   : > { %v1209_v50 = vsel %vm1205_vm10, %v1966_v45, 0.0 }
 0x3b8   : > { %v1210_v0 = vpack.c.bf16 %v1209_v50, %v1209_v50 }
 0x3ba   : > { %1212 = vst.msk [vmem:[#allocation5] sm:$0xf] %vm1211_vm12, %v1210_v0  ;;  %v1968_v48 = vpop.eup %1967 }
 0x3bb   : > { %v1970_v49 = vpop.eup %1969 }
 0x3bc   : > { %v1972_v8 = vpop.eup %1971 }
 0x3bd   : > { %v1974_v36 = vpop.eup %1973 }
 0x3be   : > { %v1976_v40 = vpop.eup %1975 }
 0x3bf   : > { %v1978_v51 = vpop.eup %1977 }
 0x3c1   : > { %v1245_v1 = vld [vmem:[#allocation5] sm:$0xf] }
 0x3c2   : > { %v1273_v52 = vsel %vm1271_vm13, %v1245_v1, 0 }
 0x3c3   : > { %1838 = vmatpush3.bf16.msra.mxu0 %v1273_v52 }
 0x3c4   : > { %1867 = vmatprep.subr.bf16.mxu0 %v2043_v42 }
 0x3c6   : > { %1840 = vmatmul.mubr.msk.bf16.vlgmr.msra.gmra.mrb[0].mxu0 %vm1261_vm14, %v1713_v43 }
 0x3c7   : > { %1843 = vmatprep.mubr.msk.bf16.mxu0 %vm2044_vm11, %v2043_v42 }
 0x3ce   : > { %1844 = vmatmul.mubr.msk.bf16.gmra.mrb[4].mxu0 %vm1261_vm14, %v1714_v44 }
 0x3cf   : > { %1847 = vmatprep.mubr.msk.bf16.mxu0 %vm2044_vm11, %v2043_v42 }
 0x3d6   : > { %1848 = vmatmul.mubr.msk.bf16.gmra.mrb[8].mxu0 %vm1261_vm14, %v1715_v63  ;;  %v1429_v63 = vld [vmem:[#allocation9 + $0x8] sm:$0xff] }
 0x3d7   : > { %1873 = vmatprep.mubr.msk.bf16.mxu0 %vm2044_vm11, %v2043_v42  ;;  %v1433_v50 = vunpack.c.l.bf16 %v1429_v63  ;;  %v1434_v0 = vunpack.c.h.bf16 %v1429_v63 }
 0x412   : > { %v1458_v32 = vpop.trf.xlu0 }
 0x499   : > { %v1309_v26 = vpop.f32.mrb[0].mxu0 }
 0x49a   : > { %v1841_v58 = vpop.f32.mrb[1].mxu0  ;;  %v1332_v27 = vmul.f32 %v1968_v48, %v1309_v26 }
 0x49b   : > { %v1312_v25 = vpop.f32.mrb[2].mxu0 }
 0x49c   : > { %v1333_v62 = vmul.f32 %v1970_v49, %v1312_v25  ;;  %v1842_v28 = vpop.f32.mrb[3].mxu0 }
 0x49e   : > { %v1338_v7 = vpack.c.bf16 %v1333_v62, %v1332_v27 }
 0x4a0   : > { %1856 = vmatmul.mubr.msk.bf16.vlgmr.msra.gmra.mrb[0].mxu1 %vm1357_vm15, %v1338_v7 }
 0x4a1   : > { %v1317_v10 = vpop.f32.mrb[4].mxu0  ;;  %1859 = vmatprep.mubr.msk.bf16.mxu1 %vm2044_vm11, %v2043_v42 }
 0x4a2   : > { %v1845_v11 = vpop.f32.mrb[5].mxu0  ;;  %v1334_v55 = vmul.f32 %v1972_v8, %v1317_v10  ;;  %v1531_v8 = vlaneseq }
 0x4a3   : > { %v1320_v13 = vpop.f32.mrb[6].mxu0 }
 0x4a4   : > { %v1335_v24 = vmul.f32 %v1974_v36, %v1320_v13  ;;  %v1846_v33 = vpop.f32.mrb[7].mxu0  ;;  %v1532_v10 = vshrl.u32 %v1531_v8, 7  ;;  %v1515_v13 = vld [vmem:[%s2524_s9] sm:$0xf] }
 0x4a6   : > { %v1339_v54 = vpack.c.bf16 %v1335_v24, %v1334_v55  ;;  %v1533_v11 = vsub.s32 0, %v1532_v10  ;;  %v1538_v55 = vsub.s32 1, %v1532_v10 }
 0x4a8   : > { %1860 = vmatmul.mubr.msk.bf16.gmra.mrb[4].mxu1 %vm1357_vm15, %v1339_v54  ;;  %v1534_v24 = vrot.slane %v1515_v13, %v1533_v11  ;;  %v1539_v54 = vrot.slane %v1515_v13, %v1538_v55 }
 0x4a9   : > { %v1325_v38 = vpop.f32.mrb[8].mxu0  ;;  %1863 = vmatprep.mubr.msk.bf16.mxu1 %vm2044_vm11, %v2043_v42 }
 0x4aa   : > { %v1849_v53 = vpop.f32.mrb[9].mxu0  ;;  %v1336_v17 = vmul.f32 %v1976_v40, %v1325_v38  ;;  %v1541_v38 = vld [vmem:[%s2515_s0] sm:$0xff] }
 0x4ab   : > { %v1328_v15 = vpop.f32.mrb[10].mxu0 }
 0x4ac   : > { %v1337_v46 = vmul.f32 %v1978_v51, %v1328_v15  ;;  %v1850_v18 = vpop.f32.mrb[11].mxu0 }
 0x4ae   : > { %v1340_v39 = vpack.c.bf16 %v1337_v46, %v1336_v17 }
 0x4b0   : > { %1864 = vmatmul.mubr.msk.bf16.gmra.mrb[8].mxu1 %vm1357_vm15, %v1340_v39 }
 0x573   : > { %v1401_v6 = vpop.f32.mrb[0].mxu1 }
 0x574   : > { %v1857_v61 = vpop.f32.mrb[1].mxu1  ;;  %v1437_v43 = vmul.f32 %v1431_v57, %v1401_v6 }
 0x575   : > { %v1404_v41 = vpop.f32.mrb[2].mxu1 }
 0x576   : > { %v1438_v12 = vmul.f32 %v1432_v56, %v1404_v41  ;;  %v1858_v44 = vpop.f32.mrb[3].mxu1 }
 0x578   : > { %v1444_v45 = vpack.c.bf16 %v1438_v12, %v1437_v43 }
 0x57a   : > { %1868 = vmatpush3.bf16.msra.mxu0 %v1444_v45 }
 0x57b   : > { %v1409_v1 = vpop.f32.mrb[4].mxu1  ;;  %1869 = vmatprep.subr.bf16.mxu0 %v2043_v42 }
 0x57c   : > { %v1861_v52 = vpop.f32.mrb[5].mxu1  ;;  %v1439_v3 = vmul.f32 %v1433_v50, %v1409_v1 }
 0x57d   : > { %v1412_v2 = vpop.f32.mrb[6].mxu1 }
 0x57e   : > { %v1440_v4 = vmul.f32 %v1434_v0, %v1412_v2  ;;  %v1862_v5 = vpop.f32.mrb[7].mxu1 }
 0x580   : > { %v1445_v9 = vpack.c.bf16 %v1440_v4, %v1439_v3 }
 0x582   : > { %1870 = vmatpush3.bf16.msra.mxu0 %v1445_v9 }
 0x583   : > { %v1417_v29 = vpop.f32.mrb[8].mxu1  ;;  %1871 = vmatprep.subr.bf16.mxu0 %v2043_v42 }
 0x584   : > { %v1865_v20 = vpop.f32.mrb[9].mxu1  ;;  %v1441_v22 = vmul.f32 %v1435_v14, %v1417_v29 }
 0x585   : > { %v1420_v21 = vpop.f32.mrb[10].mxu1 }
 0x586   : > { %v1442_v23 = vmul.f32 %v1436_v16, %v1420_v21  ;;  %v1866_v30 = vpop.f32.mrb[11].mxu1 }
 0x588   : > { %v1446_v31 = vpack.c.bf16 %v1442_v23, %v1441_v22 }
 0x58a   : > { %1872 = vmatpush3.bf16.msra.mxu0 %v1446_v31 }
 0x58d   : > { %1874 = vmatmul.mubr.msk.bf16.vlgmr.msra.gmra.mrb[12].mxu0 %vm1466_vm0, %v1458_v32 }
 0x660   : > { %v1504_v37 = vpop.f32.mrb[12].mxu0 }
 0x661   : > { %v1510_v47 = vadd.f32 %v1504_v37, %v1443_v34  ;;  %v1875_v48 = vpop.f32.mrb[13].mxu0 }
 0x662   : > { %v1507_v49 = vpop.f32.mrb[14].mxu0 }
 0x663   : > { %1511 = vst.msk [vmem:[#allocation6] sm:$0xff] %vm1357_vm15, %v1510_v47  ;;  %v1876_v26 = vpop.f32.mrb[15].mxu0 }
 0x66a   : > { %v1516_v58 = vld [vmem:[#allocation6] sm:$0xff] }
 0x66b   : > { %v1517_v42 = vsel %vm1357_vm15, %v1516_v58, 0.0 }
 0x66c   : > { %1518 = vadd.xlane.f32.xlu1 %v1517_v42 }
 0x6f9   : > { %v1519_v35 = vpop.xlane.xlu1 %1518 }
 0x6fa   : > { %v1521_v25 = vmul.f32 0.03125, %v1519_v35 }
 0x6fc   : > { %v1522_v60 = vsub.f32 %v1516_v58, %v1521_v25 }
 0x6fe   : > { %v1523_v27 = vmul.f32 %v1522_v60, %v1522_v60 }
 0x700   : > { %v1524_v62 = vsel %vm1357_vm15, %v1523_v27, 0.0 }
 0x701   : > { %1525 = vadd.xlane.f32.xlu1 %v1524_v62 }
 0x78e   : > { %v1526_v28 = vpop.xlane.xlu1 %1525 }
 0x78f   : > { %v1527_v7 = vmul.f32 0.03125, %v1526_v28 }
 0x791   : > { %v1528_v36 = vadd.f32 1e-05, %v1527_v7 }
 0x793   : > { %1979 = vrsqrt.f32 %v1528_v36 }
 0x79d   : > { %v1980_v33 = vpop.eup %1979 }
 0x79e   : > { %v1530_v40 = vmul.f32 %v1980_v33, %v1522_v60 }
 0x7a0   : > { %v1535_v51 = vmul.f32 %v1534_v24, %v1530_v40 }
 0x7a2   : > { %v1540_v53 = vadd.f32 %v1539_v54, %v1535_v51 }
 0x7a4   : > { %v1542_v15 = vadd.f32 %v1541_v38, %v1540_v53 }
 0x7a6   : > { %1543 = vst.msk [vmem:[#allocation10] sm:$0xff] %vm1357_vm15, %v1542_v15 }
 0x7a7 PF: > { %p2480_p8 = scmp.eq.s32.totalorder %s1677_s20, 1  ;;  %s2045_s24 = smov [#allocation10]  }
 0x7a8   : > { %s1559_s26 = sshll.u32 %s2045_s24, 4  ;;  %s1560_s26 = int_to_ptr.vmem [resolvable:$true] %s1559_s26 }
 0x7a9   : > { %s1981_s27 = scalar_lea.vmem %s1560_s26, 128  ;;  %p1988_p12 = scmp.lt.s32.totalorder %s1560_s26, %s1560_s26 }
 0x7aa   : > { %p1982_p9 = scmp.ne.s32.totalorder %s1560_s26, %s1981_s27  ;;  %p1989_p13 = scmp.lt.s32.totalorder %s1981_s27, %s1981_s27 }
 0x7ac   : > { %p1983_p10 = pnand %p1982_p9, %p2480_p8  ;;  %p1990_p0 = por %p1989_p13, %p1988_p12 }
 0x7ae   : > { %p1984_p11 = pneg %p1983_p10 }
 0x7b0   : > { %p1991_p1 = pnand %p1990_p0, %p1984_p11 }
 0x7b2   : > { %1994 = shalt.err (!%p1991_p1)
}
 0x7b3   : > { %s1995_s20 = scalar_lea.hbm %s2525_s10, 128 }
 0x7b4   : > { %p1996_p2 = scmp.ne.s32.totalorder %s2525_s10, %s1995_s20  ;;  %p2001_p5 = scmp.lt.u32.totalorder %s1995_s20, %s2525_s10 }
 0x7b6   : > { %p1997_p3 = pnand %p1996_p2, %p2480_p8 }
 0x7b8   : > { %p1998_p4 = pneg %p1997_p3 }
 0x7ba   : > { %p2003_p6 = pnand %p2001_p5, %p1998_p4 }
 0x7bc   : > { %2006 = shalt.err (!%p2003_p6)
}
 0x7bd   : > { %1892 = dma.vmem_to_hbm [thread:$0]  (%p2480_p8), %s1560_s26, 128, %s2525_s10, [#allocation11]  }
 0x7be   : > { %2020 = dma.done.wait (%p2480_p8), [#allocation11], 128  }
 0x7bf   : > { %2022 = vsyncadd (%p2480_p8), [#allocation11], 4294967168 }
 0x7c0 PF: > { %s23_s19 = sadd.s32 1, %s2033_s19   ;;  %s2528_s17 = smov %s2029_s18 }
 0x7c1   : > { %p20_p7 = scmp.ge.s32.totalorder %s23_s19, 4   ;;  %s2529_s18 = smov %s2531_s21 }
 0x7c3   :  { %22 = sbr.rel (!%p20_p7) target bundleno = 2 (0x2), region = 129 }
 0x7ca   :  { %1590 = vsyncpa [#allocation11], 1 }
 0x7cb   :  { %1592 = vsyncpa [#allocation11 + $0x1], 1 }

</bundles_post_ra>
